<compile_context>
chip_gen: v7x
topology: tpu7x:2x2x1
jax: 0.10.0
libtpu: 0.0.40
codegen_flags: <defaults>
</compile_context>

<pallas_src>
import jax
import jax.numpy as jnp
from jax.experimental import pallas as pl
from jax.experimental.pallas import tpu as pltpu


# ------------------------------------------------------------------ kernel --
def _dyna_mixer_kernel(xtf_ref, xt_ref, w_ref, b_ref, o_ref, attn_scr):
    """Fused DynaMixer forward for a block of bB batch elements.

    xtf_ref  : (bB, N*D)   flat (contiguous) view of the (N, D) token slab
    xt_ref   : (bB, N, D)  transposed input block (tokens x channels)
    w_ref    : (N*D, N*N)  fused fc_Nd(fc_ND(.)) weight
    b_ref    : (1, N*N)    fused bias
    o_ref    : (bB, N, D)  output block (tokens x channels)
    attn_scr : (bB, N, N)  VMEM scratch for the unflattened mixing logits
    """
    bB, N, D = xt_ref.shape

    # --- mixing logits: one fused MXU matmul --------------------------------
    logits = jnp.dot(xtf_ref[...], w_ref[...],
                     preferred_element_type=jnp.float32) + b_ref[...]

    # --- unflatten (bB, N*N) -> (bB, N, N) via N static lane-slice copies ---
    for i in range(N):
        attn_scr[:, i, :] = logits[:, i * N:(i + 1) * N]

    # --- row softmax over j (exact per-row max + exact divide) --------------
    l = attn_scr[...]
    m = jnp.max(l, axis=-1, keepdims=True)
    e = jnp.exp(l - m)
    s = jnp.sum(e, axis=-1, keepdims=True)
    attn = e / s                                     # (bB, N, N)

    # --- apply: out[b, i, :] = sum_j attn[b, i, j] * xt[b, j, :] -------------
    out = jnp.einsum('bij,bjc->bic', attn, xt_ref[...],
                     preferred_element_type=jnp.float32)
    o_ref[...] = out.astype(o_ref.dtype)


# ----------------------------------------------------------------- wrapper --
def _num_batch_blocks(B):
    """Grid steps: 2 (one per TensorCore) on multi-TC chips, else 1.

    bB is always B or a multiple of 8, so BlockSpec sublane divisibility holds.
    """
    try:
        kind = jax.devices()[0].device_kind.lower()
    except Exception:
        kind = ""
    multi_tc = "v7" in kind            # v7x: 2 TensorCores per chip
    if multi_tc and B % 2 == 0 and (B // 2) % 8 == 0:
        return 2
    return 1


def dyna_mixer_operation(x, w1, b1, w2, b2, d):
    """x: (B, D, N) f32.  w1: (d, D), b1: (d,), w2: (N*N, N*d), b2: (N*N,)."""
    B, D, N = x.shape
    NN = N * N

    # ---- one-time algebraic fusion of fc_ND and fc_Nd (tiny, plain JAX) ----
    #   logits[b, m] = sum_{n,c} xt[b, n, c] * W_fused[n*D + c, m] + b_fused[m]
    w2r = w2.reshape(NN, N, d)                                  # w2[m, n*d+k]
    w_fused = jnp.einsum('kc,mnk->ncm', w1, w2r).reshape(N * D, NN)
    b_fused = (jnp.einsum('k,mnk->m', b1, w2r) + b2).reshape(1, NN)

    # ---- lane-dense layout: tokens on sublanes, channels (D=32) on lanes ---
    xt = jnp.transpose(x, (0, 2, 1))               # (B, N, D)
    xt_flat = xt.reshape(B, N * D)                 # free contiguous view

    steps = _num_batch_blocks(B)
    bB = B // steps

    out_nd = pl.pallas_call(
        _dyna_mixer_kernel,
        out_shape=jax.ShapeDtypeStruct((B, N, D), x.dtype),
        grid=(steps,),
        in_specs=[
            pl.BlockSpec((bB, N * D), lambda i: (i, 0)),
            pl.BlockSpec((bB, N, D), lambda i: (i, 0, 0)),
            pl.BlockSpec((N * D, NN), lambda i: (0, 0)),   # replicated weights
            pl.BlockSpec((1, NN), lambda i: (0, 0)),
        ],
        out_specs=pl.BlockSpec((bB, N, D), lambda i: (i, 0, 0)),
        scratch_shapes=[pltpu.VMEM((bB, N, N), jnp.float32)],
        compiler_params=pltpu.CompilerParams(
            dimension_semantics=("parallel",)),
    )(xt_flat, xt, w_fused, b_fused)

    # Back to the module's native (B, D, N) layout.
    return jnp.transpose(out_nd, (0, 2, 1))


# --------------------------------------------------------------- reference --
def dyna_mixer_reference(x, w1, b1, w2, b2, d):
    """Pure-JAX transcription of the PyTorch forward (for verification)."""
    B, D, N = x.shape
    xt = jnp.transpose(x, (0, 2, 1))                 # b d n -> b n d
    p = xt @ w1.T + b1                               # fc_ND
    p = p.reshape(B, 1, N * d)
    p = p @ w2.T + b2                                # fc_Nd
    p = p.reshape(B, N, N)
    p = jax.nn.softmax(p, axis=2)
    out = p @ xt
    return jnp.transpose(out, (0, 2, 1))             # b n d -> b d n


if __name__ == "__main__":
    # Small shapes consistent with the module: input (B, D, N).
    B, D, N, d = 32, 32, 8, 10

    key = jax.random.PRNGKey(0)
    kx, k1, k2, k3, k4 = jax.random.split(key, 5)

    x = jax.random.normal(kx, (B, D, N), dtype=jnp.float32)

    # Deterministic synthetic parameters (shapes from nn.Linear in __init__).
    w1 = 0.1 * jax.random.normal(k1, (d, D), dtype=jnp.float32)          # fc_ND.weight
    b1 = 0.1 * jax.random.normal(k2, (d,), dtype=jnp.float32)            # fc_ND.bias
    w2 = 0.1 * jax.random.normal(k3, (N * N, N * d), dtype=jnp.float32)  # fc_Nd.weight
    b2 = 0.1 * jax.random.normal(k4, (N * N,), dtype=jnp.float32)        # fc_Nd.bias

    fwd = jax.jit(dyna_mixer_operation, static_argnums=(5,))
    out = fwd(x, w1, b1, w2, b2, d)
    out = jax.block_until_ready(out)

    ref = dyna_mixer_reference(x, w1, b1, w2, b2, d)
    assert out.shape == (B, D, N)
    assert jnp.allclose(out, ref, atol=2e-4, rtol=2e-4), "mismatch vs reference"

    print("KERNEL_OK")
</pallas_src>

<mosaic_0001>
module attributes {stable_mosaic.version = 11 : i64} {
  func.func @_dyna_mixer_kernel(%arg0: i32, %arg1: memref<32x256xf32, #tpu.memory_space<vmem>>, %arg2: memref<32x8x32xf32, #tpu.memory_space<vmem>>, %arg3: memref<256x64xf32, #tpu.memory_space<vmem>>, %arg4: memref<1x64xf32, #tpu.memory_space<vmem>>, %arg5: memref<32x8x32xf32, #tpu.memory_space<vmem>>, %arg6: memref<32x8x8xf32, #tpu.memory_space<vmem>>) attributes {dimension_semantics = [#tpu.dimension_semantics<parallel>], iteration_bounds = array<i64: 1>, scalar_prefetch = 0 : i64, scratch_operands = 1 : i64, tpu.core_type = #tpu.core_type<tc>, window_params = [{transform_indices = @transform_0, window_bounds = array<i64: 32, 256>}, {transform_indices = @transform_1, window_bounds = array<i64: 32, 8, 32>}, {pipeline_mode = #tpu.pipeline_mode<synchronous>, transform_indices = @transform_2, window_bounds = array<i64: 256, 64>}, {pipeline_mode = #tpu.pipeline_mode<synchronous>, transform_indices = @transform_3, window_bounds = array<i64: 1, 64>}, {transform_indices = @transform_4, window_bounds = array<i64: 32, 8, 32>}]} {
    %c0 = arith.constant 0 : index
    %c0_0 = arith.constant 0 : index
    %0 = vector.load %arg1[%c0, %c0_0] : memref<32x256xf32, #tpu.memory_space<vmem>>, vector<32x256xf32>
    %c0_1 = arith.constant 0 : index
    %c0_2 = arith.constant 0 : index
    %1 = vector.load %arg3[%c0_1, %c0_2] : memref<256x64xf32, #tpu.memory_space<vmem>>, vector<256x64xf32>
    %cst = arith.constant dense<0.000000e+00> : vector<32x64xf32>
    %2 = tpu.matmul %0, %1, %cst {dimension_numbers = #tpu.dot_dimension_numbers<[1], [0], [0], [1], [0, 0, 1, 1], [], []>} : vector<32x256xf32>, vector<256x64xf32>, vector<32x64xf32> -> vector<32x64xf32>
    %c0_3 = arith.constant 0 : index
    %c0_4 = arith.constant 0 : index
    %3 = vector.load %arg4[%c0_3, %c0_4] : memref<1x64xf32, #tpu.memory_space<vmem>>, vector<1x64xf32>
    %4 = vector.broadcast %3 : vector<1x64xf32> to vector<32x64xf32>
    %5 = arith.addf %2, %4 : vector<32x64xf32>
    %6 = vector.extract_strided_slice %5 {offsets = [0, 0], sizes = [32, 8], strides = [1, 1]} : vector<32x64xf32> to vector<32x8xf32>
    %c0_5 = arith.constant 0 : index
    %c0_6 = arith.constant 0 : index
    %c0_7 = arith.constant 0 : index
    %7 = vector.load %arg6[%c0_5, %c0_6, %c0_7] : memref<32x8x8xf32, #tpu.memory_space<vmem>>, vector<32x1x8xf32>
    %8 = vector.shape_cast %7 : vector<32x1x8xf32> to vector<32x8xf32>
    %9 = vector.shape_cast %6 : vector<32x8xf32> to vector<32x1x8xf32>
    tpu.vector_store %arg6[%c0_5, %c0_6, %c0_7], %9 {strides = array<i32>} : memref<32x8x8xf32, #tpu.memory_space<vmem>>, vector<32x1x8xf32>,
    %10 = vector.extract_strided_slice %5 {offsets = [0, 8], sizes = [32, 8], strides = [1, 1]} : vector<32x64xf32> to vector<32x8xf32>
    %c0_8 = arith.constant 0 : index
    %c1 = arith.constant 1 : index
    %c0_9 = arith.constant 0 : index
    %11 = vector.load %arg6[%c0_8, %c1, %c0_9] : memref<32x8x8xf32, #tpu.memory_space<vmem>>, vector<32x1x8xf32>
    %12 = vector.shape_cast %11 : vector<32x1x8xf32> to vector<32x8xf32>
    %13 = vector.shape_cast %10 : vector<32x8xf32> to vector<32x1x8xf32>
    tpu.vector_store %arg6[%c0_8, %c1, %c0_9], %13 {strides = array<i32>} : memref<32x8x8xf32, #tpu.memory_space<vmem>>, vector<32x1x8xf32>,
    %14 = vector.extract_strided_slice %5 {offsets = [0, 16], sizes = [32, 8], strides = [1, 1]} : vector<32x64xf32> to vector<32x8xf32>
    %c0_10 = arith.constant 0 : index
    %c2 = arith.constant 2 : index
    %c0_11 = arith.constant 0 : index
    %15 = vector.load %arg6[%c0_10, %c2, %c0_11] : memref<32x8x8xf32, #tpu.memory_space<vmem>>, vector<32x1x8xf32>
    %16 = vector.shape_cast %15 : vector<32x1x8xf32> to vector<32x8xf32>
    %17 = vector.shape_cast %14 : vector<32x8xf32> to vector<32x1x8xf32>
    tpu.vector_store %arg6[%c0_10, %c2, %c0_11], %17 {strides = array<i32>} : memref<32x8x8xf32, #tpu.memory_space<vmem>>, vector<32x1x8xf32>,
    %18 = vector.extract_strided_slice %5 {offsets = [0, 24], sizes = [32, 8], strides = [1, 1]} : vector<32x64xf32> to vector<32x8xf32>
    %c0_12 = arith.constant 0 : index
    %c3 = arith.constant 3 : index
    %c0_13 = arith.constant 0 : index
    %19 = vector.load %arg6[%c0_12, %c3, %c0_13] : memref<32x8x8xf32, #tpu.memory_space<vmem>>, vector<32x1x8xf32>
    %20 = vector.shape_cast %19 : vector<32x1x8xf32> to vector<32x8xf32>
    %21 = vector.shape_cast %18 : vector<32x8xf32> to vector<32x1x8xf32>
    tpu.vector_store %arg6[%c0_12, %c3, %c0_13], %21 {strides = array<i32>} : memref<32x8x8xf32, #tpu.memory_space<vmem>>, vector<32x1x8xf32>,
    %22 = vector.extract_strided_slice %5 {offsets = [0, 32], sizes = [32, 8], strides = [1, 1]} : vector<32x64xf32> to vector<32x8xf32>
    %c0_14 = arith.constant 0 : index
    %c4 = arith.constant 4 : index
    %c0_15 = arith.constant 0 : index
    %23 = vector.load %arg6[%c0_14, %c4, %c0_15] : memref<32x8x8xf32, #tpu.memory_space<vmem>>, vector<32x1x8xf32>
    %24 = vector.shape_cast %23 : vector<32x1x8xf32> to vector<32x8xf32>
    %25 = vector.shape_cast %22 : vector<32x8xf32> to vector<32x1x8xf32>
    tpu.vector_store %arg6[%c0_14, %c4, %c0_15], %25 {strides = array<i32>} : memref<32x8x8xf32, #tpu.memory_space<vmem>>, vector<32x1x8xf32>,
    %26 = vector.extract_strided_slice %5 {offsets = [0, 40], sizes = [32, 8], strides = [1, 1]} : vector<32x64xf32> to vector<32x8xf32>
    %c0_16 = arith.constant 0 : index
    %c5 = arith.constant 5 : index
    %c0_17 = arith.constant 0 : index
    %27 = vector.load %arg6[%c0_16, %c5, %c0_17] : memref<32x8x8xf32, #tpu.memory_space<vmem>>, vector<32x1x8xf32>
    %28 = vector.shape_cast %27 : vector<32x1x8xf32> to vector<32x8xf32>
    %29 = vector.shape_cast %26 : vector<32x8xf32> to vector<32x1x8xf32>
    tpu.vector_store %arg6[%c0_16, %c5, %c0_17], %29 {strides = array<i32>} : memref<32x8x8xf32, #tpu.memory_space<vmem>>, vector<32x1x8xf32>,
    %30 = vector.extract_strided_slice %5 {offsets = [0, 48], sizes = [32, 8], strides = [1, 1]} : vector<32x64xf32> to vector<32x8xf32>
    %c0_18 = arith.constant 0 : index
    %c6 = arith.constant 6 : index
    %c0_19 = arith.constant 0 : index
    %31 = vector.load %arg6[%c0_18, %c6, %c0_19] : memref<32x8x8xf32, #tpu.memory_space<vmem>>, vector<32x1x8xf32>
    %32 = vector.shape_cast %31 : vector<32x1x8xf32> to vector<32x8xf32>
    %33 = vector.shape_cast %30 : vector<32x8xf32> to vector<32x1x8xf32>
    tpu.vector_store %arg6[%c0_18, %c6, %c0_19], %33 {strides = array<i32>} : memref<32x8x8xf32, #tpu.memory_space<vmem>>, vector<32x1x8xf32>,
    %34 = vector.extract_strided_slice %5 {offsets = [0, 56], sizes = [32, 8], strides = [1, 1]} : vector<32x64xf32> to vector<32x8xf32>
    %c0_20 = arith.constant 0 : index
    %c7 = arith.constant 7 : index
    %c0_21 = arith.constant 0 : index
    %35 = vector.load %arg6[%c0_20, %c7, %c0_21] : memref<32x8x8xf32, #tpu.memory_space<vmem>>, vector<32x1x8xf32>
    %36 = vector.shape_cast %35 : vector<32x1x8xf32> to vector<32x8xf32>
    %37 = vector.shape_cast %34 : vector<32x8xf32> to vector<32x1x8xf32>
    tpu.vector_store %arg6[%c0_20, %c7, %c0_21], %37 {strides = array<i32>} : memref<32x8x8xf32, #tpu.memory_space<vmem>>, vector<32x1x8xf32>,
    %c0_22 = arith.constant 0 : index
    %c0_23 = arith.constant 0 : index
    %c0_24 = arith.constant 0 : index
    %38 = vector.load %arg6[%c0_22, %c0_23, %c0_24] : memref<32x8x8xf32, #tpu.memory_space<vmem>>, vector<32x8x8xf32>
    %cst_25 = arith.constant dense<0xFF800000> : vector<32x8xf32>
    %39 = vector.multi_reduction <maximumf>, %38, %cst_25 [2] : vector<32x8x8xf32> to vector<32x8xf32>
    %40 = vector.shape_cast %39 : vector<32x8xf32> to vector<32x8x1xf32>
    %41 = vector.broadcast %40 : vector<32x8x1xf32> to vector<32x8x8xf32>
    %42 = arith.subf %38, %41 : vector<32x8x8xf32>
    %43 = math.exp %42 : vector<32x8x8xf32>
    %cst_26 = arith.constant dense<0.000000e+00> : vector<32x8xf32>
    %44 = vector.multi_reduction <add>, %43, %cst_26 [2] : vector<32x8x8xf32> to vector<32x8xf32>
    %45 = vector.shape_cast %44 : vector<32x8xf32> to vector<32x8x1xf32>
    %46 = vector.broadcast %45 : vector<32x8x1xf32> to vector<32x8x8xf32>
    %47 = arith.divf %43, %46 : vector<32x8x8xf32>
    %c0_27 = arith.constant 0 : index
    %c0_28 = arith.constant 0 : index
    %c0_29 = arith.constant 0 : index
    %48 = vector.load %arg2[%c0_27, %c0_28, %c0_29] : memref<32x8x32xf32, #tpu.memory_space<vmem>>, vector<32x8x32xf32>
    "tpu.trace_start"() <{level = 10 : i32, message = "bij,bjc->bic"}> : () -> ()
    %cst_30 = arith.constant dense<0.000000e+00> : vector<32x8x32xf32>
    %49 = tpu.matmul %47, %48, %cst_30 {dimension_numbers = #tpu.dot_dimension_numbers<[2], [1], [1], [2], [0, 0, 0, 1, 1, 2], [0], [0]>} : vector<32x8x8xf32>, vector<32x8x32xf32>, vector<32x8x32xf32> -> vector<32x8x32xf32>
    "tpu.trace_stop"() : () -> ()
    %c0_31 = arith.constant 0 : index
    %c0_32 = arith.constant 0 : index
    %c0_33 = arith.constant 0 : index
    %50 = vector.load %arg5[%c0_31, %c0_32, %c0_33] : memref<32x8x32xf32, #tpu.memory_space<vmem>>, vector<32x8x32xf32>
    tpu.vector_store %arg5[%c0_31, %c0_32, %c0_33], %49 {strides = array<i32>} : memref<32x8x32xf32, #tpu.memory_space<vmem>>, vector<32x8x32xf32>,
    return
  }
  func.func @transform_0(%arg0: i32) -> (i32, i32) {
    %c0_i32 = arith.constant 0 : i32
    %c0_i32_0 = arith.constant 0 : i32
    return %arg0, %c0_i32 : i32, i32
  }
  func.func @transform_1(%arg0: i32) -> (i32, i32, i32) {
    %c0_i32 = arith.constant 0 : i32
    %c0_i32_0 = arith.constant 0 : i32
    %c0_i32_1 = arith.constant 0 : i32
    return %arg0, %c0_i32, %c0_i32_0 : i32, i32, i32
  }
  func.func @transform_2(%arg0: i32) -> (i32, i32) {
    %c0_i32 = arith.constant 0 : i32
    %c0_i32_0 = arith.constant 0 : i32
    %c0_i32_1 = arith.constant 0 : i32
    return %c0_i32, %c0_i32_0 : i32, i32
  }
  func.func @transform_3(%arg0: i32) -> (i32, i32) {
    %c0_i32 = arith.constant 0 : i32
    %c0_i32_0 = arith.constant 0 : i32
    %c0_i32_1 = arith.constant 0 : i32
    return %c0_i32, %c0_i32_0 : i32, i32
  }
  func.func @transform_4(%arg0: i32) -> (i32, i32, i32) {
    %c0_i32 = arith.constant 0 : i32
    %c0_i32_0 = arith.constant 0 : i32
    %c0_i32_1 = arith.constant 0 : i32
    return %arg0, %c0_i32, %c0_i32_0 : i32, i32, i32
  }
}

</mosaic_0001>

<bundles_post_ra>
// kernel: dyna_mixer_operation.1
= control target key start
LH: loop header
LB: loop body
LE: loop exit
PB: predicated region body
PF: predicated region fallthrough
CT: control target
= control target key end

     0   :  { %s6301_s0 = inlined_call_operand.vmem [shape: f32[32,256], index: 0, kind: input, shape index: {}]   ;;  %s6302_s1 = inlined_call_operand.vmem [shape: f32[32,8,32], index: 1, kind: input, shape index: {}]   ;;  %s6303_s2 = inlined_call_operand.vmem [shape: f32[256,64], index: 2, kind: input, shape index: {}]   ;;  %s6304_s3 = inlined_call_operand.vmem [shape: f32[1,64], index: 3, kind: input, shape index: {}]   ;;  %s6305_s4 = inlined_call_operand.hbm [shape: f32[32,8,32], index: 4, kind: output, shape index: {}]  }
   0x1   :  { %v42_v0 = vld [vmem:[%s6303_s2 + $0x80] sm:$0xff]  ;;  %v43_v1 = vld [vmem:[%s6303_s2 + $0x88] sm:$0xff]  ;;  %v44_v5 = vld [vmem:[%s6303_s2 + $0x90] sm:$0xff] }
   0x2   :  { %v26_v2 = vld [vmem:[%s6303_s2] sm:$0xff]  ;;  %v4542_v3 = vpack.c.bf16 %v43_v1, %v42_v0  ;;  %v27_v4 = vld [vmem:[%s6303_s2 + $0x8] sm:$0xff]  ;;  %v45_v6 = vld [vmem:[%s6303_s2 + $0x98] sm:$0xff] }
   0x3   :  { %v4544_v7 = vpack.c.bf16 %v27_v4, %v26_v2  ;;  %v4546_v8 = vpack.c.bf16 %v45_v6, %v44_v5  ;;  %v28_v9 = vld [vmem:[%s6303_s2 + $0x10] sm:$0xff]  ;;  %v29_v10 = vld [vmem:[%s6303_s2 + $0x18] sm:$0xff]  ;;  %v46_v11 = vld [vmem:[%s6303_s2 + $0xa0] sm:$0xff] }
   0x4   :  { %4543 = vmatprep.subr.bf16.mxu0 %v4542_v3  ;;  %v47_v12 = vld [vmem:[%s6303_s2 + $0xa8] sm:$0xff]  ;;  %v4548_v13 = vpack.c.bf16 %v29_v10, %v28_v9  ;;  %v30_v15 = vld [vmem:[%s6303_s2 + $0x20] sm:$0xff]  ;;  %v48_v17 = vld [vmem:[%s6303_s2 + $0xb0] sm:$0xff] }
   0x5   :  { %4545 = vmatpush3.bf16.msra.mxu0 %v4544_v7  ;;  %v4550_v14 = vpack.c.bf16 %v47_v12, %v46_v11  ;;  %v31_v16 = vld [vmem:[%s6303_s2 + $0x28] sm:$0xff]  ;;  %v49_v18 = vld [vmem:[%s6303_s2 + $0xb8] sm:$0xff]  ;;  %v32_v21 = vld [vmem:[%s6303_s2 + $0x30] sm:$0xff] }
   0x6   :  { %4547 = vmatprep.subr.bf16.mxu0 %v4546_v8  ;;  %v4552_v19 = vpack.c.bf16 %v31_v16, %v30_v15  ;;  %v4554_v20 = vpack.c.bf16 %v49_v18, %v48_v17  ;;  %v33_v22 = vld [vmem:[%s6303_s2 + $0x38] sm:$0xff]  ;;  %v50_v23 = vld [vmem:[%s6303_s2 + $0xc0] sm:$0xff]  ;;  %v51_v24 = vld [vmem:[%s6303_s2 + $0xc8] sm:$0xff] }
   0x7   :  { %v19_v25 = vld [vmem:[%s6301_s0 + $0x8] sm:$0xff]  ;;  %v4556_v26 = vpack.c.bf16 %v33_v22, %v32_v21 }
   0x8   :  { %129 = vmatprep.mubr.f32.mxu0 %v19_v25 }
   0x9   :  { %4549 = vmatpush3.bf16.msra.mxu0 %v4548_v13 }
   0xa   :  { %4551 = vmatprep.subr.bf16.mxu0 %v4550_v14 }
   0xd   :  { %4553 = vmatpush3.bf16.msra.mxu0 %v4552_v19 }
   0xe   :  { %9 = vsyncpa [#allocation4], 0  ;;  %4555 = vmatprep.subr.bf16.mxu0 %v4554_v20  ;;  %v4558_v27 = vpack.c.bf16 %v51_v24, %v50_v23  ;;  %v34_v28 = vld [vmem:[%s6303_s2 + $0x40] sm:$0xff]  ;;  %v35_v29 = vld [vmem:[%s6303_s2 + $0x48] sm:$0xff]  ;;  %v4739_v56 = vmov 1966171168   ;;  %v158_v58 = vlaneseq }
   0xf   :  { %v52_v30 = vld [vmem:[%s6303_s2 + $0xd0] sm:$0xff]  ;;  %v53_v31 = vld [vmem:[%s6303_s2 + $0xd8] sm:$0xff]  ;;  %v4560_v32 = vpack.c.bf16 %v35_v29, %v34_v28  ;;  %v54_v36 = vld [vmem:[%s6303_s2 + $0xe0] sm:$0xff]  ;;  %v156_v57 = vunpack.c.l.s4 %v4739_v56  ;;  %vm382_vm0 = vcmask 57344   ;;  %s4742_s18 = smov 96   ;;  %s4743_s19 = smov 104  }
  0x10   :  { %v4562_v33 = vpack.c.bf16 %v53_v31, %v52_v30  ;;  %v36_v34 = vld [vmem:[%s6303_s2 + $0x50] sm:$0xff]  ;;  %v37_v35 = vld [vmem:[%s6303_s2 + $0x58] sm:$0xff]  ;;  %v55_v37 = vld [vmem:[%s6303_s2 + $0xe8] sm:$0xff]  ;;  %v159_v60 = vshrl.u32 %v158_v58, 7  ;;  %s4744_s20 = smov 80   ;;  %s4745_s21 = smov 88  }
  0x11   :  { %4557 = vmatpush3.bf16.msra.mxu0 %v4556_v26  ;;  %v4564_v38 = vpack.c.bf16 %v37_v35, %v36_v34  ;;  %v4566_v39 = vpack.c.bf16 %v55_v37, %v54_v36  ;;  %v38_v40 = vld [vmem:[%s6303_s2 + $0x60] sm:$0xff]  ;;  %v39_v41 = vld [vmem:[%s6303_s2 + $0x68] sm:$0xff]  ;;  %v56_v42 = vld [vmem:[%s6303_s2 + $0xf0] sm:$0xff]  ;;  %v157_v59 = vunpack.c.0.s8 %v156_v57  ;;  %s4746_s22 = smov 72   ;;  %vm1471_vm1 = vcmask 64512  }
  0x12   :  { %4559 = vmatprep.subr.bf16.mxu0 %v4558_v27  ;;  %v57_v43 = vld [vmem:[%s6303_s2 + $0xf8] sm:$0xff]  ;;  %v4568_v44 = vpack.c.bf16 %v39_v41, %v38_v40  ;;  %v40_v46 = vld [vmem:[%s6303_s2 + $0x70] sm:$0xff]  ;;  %v18_v49 = vld [vmem:[%s6301_s0] sm:$0xff]  ;;  %v4906_v8 = vsub.s32 0, %v159_v60  ;;  %vm4748_vm2 = vmmov 0   ;;  %vm4192_vm3 = vcmask 261120  }
  0x13   :  { %v4570_v45 = vpack.c.bf16 %v57_v43, %v56_v42  ;;  %v41_v47 = vld [vmem:[%s6303_s2 + $0x78] sm:$0xff]  ;;  %v20_v51 = vld [vmem:[%s6301_s0 + $0x10] sm:$0xff]  ;;  %v23_v52 = vld [vmem:[%s6301_s0 + $0x28] sm:$0xff]  ;;  %v4902_v1 = vsub.s32 %v157_v59, %v159_v60 }
  0x14   :  { %v4572_v48 = vpack.c.bf16 %v41_v47, %v40_v46  ;;  %v21_v50 = vld [vmem:[%s6301_s0 + $0x18] sm:$0xff]  ;;  %v22_v53 = vld [vmem:[%s6301_s0 + $0x20] sm:$0xff]  ;;  %v24_v55 = vld [vmem:[%s6301_s0 + $0x30] sm:$0xff] }
  0x15   :  { %4561 = vmatpush3.bf16.msra.mxu0 %v4560_v32  ;;  %v25_v54 = vld [vmem:[%s6301_s0 + $0x38] sm:$0xff]  ;;  %v4900_v62 = vld [vmem:[%s6304_s3] ss:$0 sm:$0xff]  ;;  %s4740_s0 = smov 112   ;;  %s4741_s3 = smov 120  }
  0x16   :  { %4563 = vmatprep.subr.bf16.mxu0 %v4562_v33 }
  0x19   :  { %4565 = vmatpush3.bf16.msra.mxu0 %v4564_v38 }
  0x1a   :  { %4567 = vmatprep.subr.bf16.mxu0 %v4566_v39 }
  0x1d   :  { %4569 = vmatpush3.bf16.msra.mxu0 %v4568_v44 }
  0x1e   :  { %4571 = vmatprep.subr.bf16.mxu0 %v4570_v45 }
  0x21   :  { %4573 = vmatpush3.bf16.msra.mxu0 %v4572_v48 }
  0x24   :  { %130 = vmatmul.mubr.f32.vlgmr.msra.gmra.mrb[0].mxu0 %v18_v49 }
  0x25   :  { %134 = vmatprep.mubr.f32.mxu0 %v21_v50 }
  0x28   :  { %135 = vmatmul.mubr.f32.gmra.mrb[2].mxu0 %v20_v51 }
  0x29   :  { %139 = vmatprep.mubr.f32.mxu0 %v23_v52 }
  0x2c   :  { %140 = vmatmul.mubr.f32.gmra.mrb[4].mxu0 %v22_v53 }
  0x2d   :  { %144 = vmatprep.mubr.f32.mxu0 %v25_v54 }
  0x30   :  { %145 = vmatmul.mubr.f32.gmra.mrb[6].mxu0 %v24_v55 }
  0xf7   :  { %v4306_v61 = vpop.f32.mrb[0].mxu0 }
  0xf8   :  { %v4307_v63 = vpop.f32.mrb[1].mxu0 }
  0xf9   :  { %v4308_v0 = vadd.f32 %v4307_v63, %v4306_v61 }
  0xfb   :  { %v132_v2 = vadd.f32 %v4308_v0, %v4900_v62  ;;  %v4309_v3 = vpop.f32.mrb[2].mxu0 }
  0xfc   :  { %v4310_v4 = vpop.f32.mrb[3].mxu0 }
  0xfd   :  { %v154_v5 = vcombine.high %v132_v2, %v132_v2  ;;  %v161_v6 = vrot.slane %v132_v2, %v4902_v1  ;;  %v4311_v7 = vadd.f32 %v4310_v4, %v4309_v3 }
  0xff   :  { %v168_v9 = vrot.slane %v154_v5, %v4902_v1  ;;  %v169_v10 = vcombine.high %v161_v6, %v161_v6  ;;  %v177_v11 = vrot.slane %v161_v6, %v4902_v1  ;;  %v137_v12 = vadd.f32 %v4311_v7, %v4900_v62  ;;  %v4312_v38 = vpop.f32.mrb[4].mxu0 }
 0x100   :  { %v4313_v39 = vpop.f32.mrb[5].mxu0 }
 0x101   :  { %v170_v13 = vcombine.high %v168_v9, %v168_v9  ;;  %v184_v14 = vrot.slane %v168_v9, %v4902_v1  ;;  %v191_v15 = vrot.slane %v169_v10, %v4902_v1  ;;  %v199_v16 = vcombine.high %v177_v11, %v177_v11  ;;  %383 = vst.msk [vmem:[#allocation2] sm:$0x1] %vm382_vm0, %v177_v11 }
 0x102   :  { %v418_v17 = vrot.slane %v177_v11, %v4906_v8  ;;  %v203_v18 = vcombine.high %v137_v12, %v137_v12  ;;  %v210_v19 = vrot.slane %v137_v12, %v4902_v1  ;;  %v4314_v40 = vadd.f32 %v4313_v39, %v4312_v38 }
 0x103   :  { %v4917_v20 = vrot.slane %v170_v13, %v4902_v1  ;;  %v4919_v21 = vcombine.high %v184_v14, %v184_v14  ;;  %v4921_v22 = vcombine.high %v191_v15, %v191_v15  ;;  %384 = vst.msk [vmem:[#allocation2 + $0x8] sm:$0x1] %vm382_vm0, %v191_v15  ;;  %385 = vst.msk [vmem:[#allocation2 + $0x10] sm:$0x1] %vm382_vm0, %v199_v16  ;;  %v4315_v7 = vpop.f32.mrb[6].mxu0 }
 0x104   :  { %387 = vst.msk [vmem:[#allocation2 + $0x20] sm:$0x1] %vm382_vm0, %v184_v14  ;;  %671 = vrot.lane.b32.xlu1 %v418_v17, %s4740_s0  ;;  %543 = vrot.lane.b32.xlu0 %v418_v17, %s4741_s3  ;;  %v217_v23 = vrot.slane %v203_v18, %v4902_v1  ;;  %v218_v25 = vcombine.high %v210_v19, %v210_v19  ;;  %v4316_v9 = vpop.f32.mrb[7].mxu0 }
 0x105   :  { %v4931_v24 = vcombine.high %v4917_v20, %v4917_v20  ;;  %386 = vst.msk [vmem:[#allocation2 + $0x18] sm:$0x1] %vm382_vm0, %v4921_v22  ;;  %388 = vst.msk [vmem:[#allocation2 + $0x28] sm:$0x1] %vm382_vm0, %v4917_v20  ;;  %v4940_v27 = vrot.slane %v210_v19, %v4902_v1  ;;  %v426_v35 = vrot.slane %v199_v16, %v4906_v8 }
 0x106   :  { %389 = vst.msk [vmem:[#allocation2 + $0x30] sm:$0x1] %vm382_vm0, %v4919_v21  ;;  %v219_v26 = vcombine.high %v217_v23, %v217_v23  ;;  %v4943_v28 = vrot.slane %v217_v23, %v4902_v1  ;;  %v4950_v29 = vrot.slane %v218_v25, %v4902_v1  ;;  %v422_v36 = vrot.slane %v191_v15, %v4906_v8 }
 0x107   :  { %390 = vst.msk [vmem:[#allocation2 + $0x38] sm:$0x1] %vm382_vm0, %v4931_v24  ;;  %v4957_v31 = vcombine.high %v4940_v27, %v4940_v27  ;;  %391 = vst.msk [vmem:[#allocation2 + $0x40] sm:$0x1] %vm382_vm0, %v4940_v27  ;;  %v434_v37 = vrot.slane %v184_v14, %v4906_v8  ;;  %v142_v41 = vadd.f32 %v4314_v40, %v4900_v62 }
 0x108   :  { %927 = vrot.lane.b32.xlu1 %v418_v17, %s4742_s18  ;;  %799 = vrot.lane.b32.xlu0 %v418_v17, %s4743_s19  ;;  %v4953_v30 = vrot.slane %v219_v26, %v4902_v1  ;;  %395 = vst.msk [vmem:[#allocation2 + $0x60] sm:$0x1] %vm382_vm0, %v4943_v28  ;;  %v4965_v32 = vcombine.high %v4943_v28, %v4943_v28  ;;  %392 = vst.msk [vmem:[#allocation2 + $0x48] sm:$0x1] %vm382_vm0, %v4950_v29 }
 0x109   :  { %v4969_v33 = vcombine.high %v4950_v29, %v4950_v29  ;;  %393 = vst.msk [vmem:[#allocation2 + $0x50] sm:$0x1] %vm382_vm0, %v4957_v31  ;;  %v252_v42 = vcombine.high %v142_v41, %v142_v41  ;;  %v259_v43 = vrot.slane %v142_v41, %v4902_v1  ;;  %v430_v55 = vrot.slane %v4921_v22, %v4906_v8 }
 0x10a   :  { %v4973_v34 = vcombine.high %v4953_v30, %v4953_v30  ;;  %396 = vst.msk [vmem:[#allocation2 + $0x68] sm:$0x1] %vm382_vm0, %v4953_v30  ;;  %397 = vst.msk [vmem:[#allocation2 + $0x70] sm:$0x1] %vm382_vm0, %v4965_v32  ;;  %v438_v56 = vrot.slane %v4917_v20, %v4906_v8  ;;  %v442_v57 = vrot.slane %v4919_v21, %v4906_v8 }
 0x10b   :  { %394 = vst.msk [vmem:[#allocation2 + $0x58] sm:$0x1] %vm382_vm0, %v4969_v33  ;;  %v266_v44 = vrot.slane %v252_v42, %v4902_v1  ;;  %v267_v45 = vcombine.high %v259_v43, %v259_v43  ;;  %v5006_v46 = vrot.slane %v259_v43, %v4902_v1  ;;  %v450_v58 = vrot.slane %v4940_v27, %v4906_v8 }
 0x10c   :  { %1183 = vrot.lane.b32.xlu1 %v418_v17, %s4744_s20  ;;  %1055 = vrot.lane.b32.xlu0 %v418_v17, %s4745_s21  ;;  %398 = vst.msk [vmem:[#allocation2 + $0x78] sm:$0x1] %vm382_vm0, %v4973_v34  ;;  %v446_v59 = vrot.slane %v4931_v24, %v4906_v8  ;;  %v5101_v60 = vrot.slane %v4950_v29, %v4906_v8 }
 0x10d   :  { %v268_v47 = vcombine.high %v266_v44, %v266_v44  ;;  %v5011_v48 = vrot.slane %v266_v44, %v4902_v1  ;;  %v5014_v49 = vrot.slane %v267_v45, %v4902_v1  ;;  %v5018_v50 = vcombine.high %v5006_v46, %v5006_v46  ;;  %399 = vst.msk [vmem:[#allocation2 + $0x80] sm:$0x1] %vm382_vm0, %v5006_v46 }
 0x10e   :  { %v5108_v61 = vrot.slane %v4957_v31, %v4906_v8  ;;  %v5117_v2 = vrot.slane %v4943_v28, %v4906_v8  ;;  %v4317_v12 = vadd.f32 %v4316_v9, %v4315_v7  ;;  %v5223_v43 = vrot.slane %v4965_v32, %v4906_v8 }
 0x10f   :  { %v5023_v51 = vrot.slane %v268_v47, %v4902_v1  ;;  %v5027_v52 = vcombine.high %v5011_v48, %v5011_v48  ;;  %v5031_v53 = vcombine.high %v5014_v49, %v5014_v49  ;;  %400 = vst.msk [vmem:[#allocation2 + $0x88] sm:$0x1] %vm382_vm0, %v5014_v49  ;;  %401 = vst.msk [vmem:[#allocation2 + $0x90] sm:$0x1] %vm382_vm0, %v5018_v50 }
 0x110   :  { %1311 = vrot.lane.b32.xlu0 %v418_v17, %s4746_s22  ;;  %547 = vrot.lane.b32.xlu1 %v426_v35, %s4741_s3  ;;  %403 = vst.msk [vmem:[#allocation2 + $0xa0] sm:$0x1] %vm382_vm0, %v5011_v48  ;;  %v147_v13 = vadd.f32 %v4317_v12, %v4900_v62  ;;  %v5229_v47 = vrot.slane %v5006_v46, %v4906_v8 }
 0x111   :  { %v5043_v54 = vcombine.high %v5023_v51, %v5023_v51  ;;  %402 = vst.msk [vmem:[#allocation2 + $0x98] sm:$0x1] %vm382_vm0, %v5031_v53  ;;  %404 = vst.msk [vmem:[#allocation2 + $0xa8] sm:$0x1] %vm382_vm0, %v5023_v51  ;;  %v462_v32 = vrot.slane %v4969_v33, %v4906_v8  ;;  %v5287_v12 = vrot.slane %v5018_v50, %v4906_v8 }
 0x112   :  { %405 = vst.msk [vmem:[#allocation2 + $0xb0] sm:$0x1] %vm382_vm0, %v5027_v52  ;;  %v301_v16 = vcombine.high %v147_v13, %v147_v13  ;;  %v308_v17 = vrot.slane %v147_v13, %v4902_v1  ;;  %v478_v50 = vrot.slane %v4973_v34, %v4906_v8 }
 0x113   :  { %406 = vst.msk [vmem:[#allocation2 + $0xb8] sm:$0x1] %vm382_vm0, %v5043_v54 }
 0x114   :  { %673 = vrot.lane.b32.xlu1 %v422_v36, %s4740_s0  ;;  %545 = vrot.lane.b32.xlu0 %v422_v36, %s4741_s3  ;;  %v315_v18 = vrot.slane %v301_v16, %v4902_v1  ;;  %v316_v19 = vcombine.high %v308_v17, %v308_v17  ;;  %v5142_v20 = vrot.slane %v308_v17, %v4902_v1 }
 0x116   :  { %v317_v22 = vcombine.high %v315_v18, %v315_v18  ;;  %v5145_v23 = vrot.slane %v315_v18, %v4902_v1  ;;  %v5148_v24 = vrot.slane %v316_v19, %v4902_v1  ;;  %v5152_v25 = vcombine.high %v5142_v20, %v5142_v20  ;;  %407 = vst.msk [vmem:[#allocation2 + $0xc0] sm:$0x1] %vm382_vm0, %v5142_v20 }
 0x118   :  { %929 = vrot.lane.b32.xlu1 %v422_v36, %s4742_s18  ;;  %551 = vrot.lane.b32.xlu0 %v434_v37, %s4741_s3  ;;  %v5163_v26 = vrot.slane %v317_v22, %v4902_v1  ;;  %v5167_v27 = vcombine.high %v5145_v23, %v5145_v23  ;;  %v5171_v28 = vcombine.high %v5148_v24, %v5148_v24 }
 0x119   :  { %408 = vst.msk [vmem:[#allocation2 + $0xc8] sm:$0x1] %vm382_vm0, %v5148_v24  ;;  %409 = vst.msk [vmem:[#allocation2 + $0xd0] sm:$0x1] %vm382_vm0, %v5152_v25 }
 0x11a   :  { %411 = vst.msk [vmem:[#allocation2 + $0xe0] sm:$0x1] %vm382_vm0, %v5145_v23  ;;  %v5181_v31 = vcombine.high %v5163_v26, %v5163_v26  ;;  %410 = vst.msk [vmem:[#allocation2 + $0xd8] sm:$0x1] %vm382_vm0, %v5171_v28 }
 0x11b   :  { %412 = vst.msk [vmem:[#allocation2 + $0xe8] sm:$0x1] %vm382_vm0, %v5163_v26  ;;  %413 = vst.msk [vmem:[#allocation2 + $0xf0] sm:$0x1] %vm382_vm0, %v5167_v27 }
 0x11c   :  { %1185 = vrot.lane.b32.xlu1 %v422_v36, %s4744_s20  ;;  %801 = vrot.lane.b32.xlu0 %v422_v36, %s4743_s19  ;;  %414 = vst.msk [vmem:[#allocation2 + $0xf8] sm:$0x1] %vm382_vm0, %v5181_v31 }
 0x120   :  { %675 = vrot.lane.b32.xlu1 %v426_v35, %s4740_s0  ;;  %1057 = vrot.lane.b32.xlu0 %v422_v36, %s4745_s21 }
 0x124   :  { %931 = vrot.lane.b32.xlu1 %v426_v35, %s4742_s18  ;;  %1313 = vrot.lane.b32.xlu0 %v422_v36, %s4746_s22 }
 0x128   :  { %1187 = vrot.lane.b32.xlu1 %v426_v35, %s4744_s20  ;;  %803 = vrot.lane.b32.xlu0 %v426_v35, %s4743_s19 }
 0x12c   :  { %679 = vrot.lane.b32.xlu1 %v434_v37, %s4740_s0  ;;  %1059 = vrot.lane.b32.xlu0 %v426_v35, %s4745_s21 }
 0x130   :  { %935 = vrot.lane.b32.xlu1 %v434_v37, %s4742_s18  ;;  %1315 = vrot.lane.b32.xlu0 %v426_v35, %s4746_s22 }
 0x134   :  { %1191 = vrot.lane.b32.xlu1 %v434_v37, %s4744_s20  ;;  %807 = vrot.lane.b32.xlu0 %v434_v37, %s4743_s19 }
 0x138   :  { %549 = vrot.lane.b32.xlu1 %v430_v55, %s4741_s3  ;;  %1063 = vrot.lane.b32.xlu0 %v434_v37, %s4745_s21 }
 0x13c   :  { %1319 = vrot.lane.b32.xlu0 %v434_v37, %s4746_s22  ;;  %553 = vrot.lane.b32.xlu1 %v438_v56, %s4741_s3 }
 0x140   :  { %555 = vrot.lane.b32.xlu0 %v442_v57, %s4741_s3  ;;  %677 = vrot.lane.b32.xlu1 %v430_v55, %s4740_s0 }
 0x144   :  { %559 = vrot.lane.b32.xlu0 %v450_v58, %s4741_s3  ;;  %933 = vrot.lane.b32.xlu1 %v430_v55, %s4742_s18 }
 0x148   :  { %805 = vrot.lane.b32.xlu0 %v430_v55, %s4743_s19  ;;  %1189 = vrot.lane.b32.xlu1 %v430_v55, %s4744_s20 }
 0x14c   :  { %1061 = vrot.lane.b32.xlu0 %v430_v55, %s4745_s21  ;;  %681 = vrot.lane.b32.xlu1 %v438_v56, %s4740_s0 }
 0x150   :  { %1317 = vrot.lane.b32.xlu0 %v430_v55, %s4746_s22  ;;  %937 = vrot.lane.b32.xlu1 %v438_v56, %s4742_s18 }
 0x154   :  { %809 = vrot.lane.b32.xlu0 %v438_v56, %s4743_s19  ;;  %1193 = vrot.lane.b32.xlu1 %v438_v56, %s4744_s20 }
 0x158   :  { %1065 = vrot.lane.b32.xlu0 %v438_v56, %s4745_s21  ;;  %683 = vrot.lane.b32.xlu1 %v442_v57, %s4740_s0 }
 0x15c   :  { %1321 = vrot.lane.b32.xlu0 %v438_v56, %s4746_s22  ;;  %939 = vrot.lane.b32.xlu1 %v442_v57, %s4742_s18 }
 0x160   :  { %811 = vrot.lane.b32.xlu0 %v442_v57, %s4743_s19  ;;  %1195 = vrot.lane.b32.xlu1 %v442_v57, %s4744_s20 }
 0x164   :  { %1067 = vrot.lane.b32.xlu0 %v442_v57, %s4745_s21  ;;  %687 = vrot.lane.b32.xlu1 %v450_v58, %s4740_s0 }
 0x168   :  { %1323 = vrot.lane.b32.xlu0 %v442_v57, %s4746_s22  ;;  %943 = vrot.lane.b32.xlu1 %v450_v58, %s4742_s18 }
 0x16c   :  { %815 = vrot.lane.b32.xlu0 %v450_v58, %s4743_s19  ;;  %1199 = vrot.lane.b32.xlu1 %v450_v58, %s4744_s20 }
 0x170   :  { %1071 = vrot.lane.b32.xlu0 %v450_v58, %s4745_s21  ;;  %557 = vrot.lane.b32.xlu1 %v446_v59, %s4741_s3 }
 0x174   :  { %1327 = vrot.lane.b32.xlu0 %v450_v58, %s4746_s22  ;;  %561 = vrot.lane.b32.xlu1 %v5101_v60, %s4741_s3 }
 0x176   :  { %v672_v63 = vpop.permute.xlu1 %671  ;;  %v544_v0 = vpop.permute.xlu0 %543 }
 0x177   :  { %767 = vst.msk [vmem:[#allocation2 + $0x2] sm:$0x1] %vm382_vm0, %v672_v63  ;;  %639 = vst.msk [vmem:[#allocation2 + $0x1] sm:$0x1] %vm382_vm0, %v544_v0 }
 0x178   :  { %563 = vrot.lane.b32.xlu0 %v5108_v61, %s4741_s3  ;;  %685 = vrot.lane.b32.xlu1 %v446_v59, %s4740_s0 }
 0x17a   :  { %v928_v3 = vpop.permute.xlu1 %927  ;;  %v800_v4 = vpop.permute.xlu0 %799 }
 0x17b   :  { %1023 = vst.msk [vmem:[#allocation2 + $0x4] sm:$0x1] %vm382_vm0, %v928_v3  ;;  %895 = vst.msk [vmem:[#allocation2 + $0x3] sm:$0x1] %vm382_vm0, %v800_v4 }
 0x17c   :  { %567 = vrot.lane.b32.xlu0 %v5117_v2, %s4741_s3  ;;  %941 = vrot.lane.b32.xlu1 %v446_v59, %s4742_s18 }
 0x17e   :  { %v1184_v5 = vpop.permute.xlu1 %1183  ;;  %v1056_v6 = vpop.permute.xlu0 %1055 }
 0x17f   :  { %1279 = vst.msk [vmem:[#allocation2 + $0x6] sm:$0x1] %vm382_vm0, %v1184_v5  ;;  %1151 = vst.msk [vmem:[#allocation2 + $0x5] sm:$0x1] %vm382_vm0, %v1056_v6 }
 0x180   :  { %813 = vrot.lane.b32.xlu0 %v446_v59, %s4743_s19  ;;  %1197 = vrot.lane.b32.xlu1 %v446_v59, %s4744_s20 }
 0x182   :  { %v1312_v10 = vpop.permute.xlu0 %1311  ;;  %v548_v11 = vpop.permute.xlu1 %547 }
 0x183   :  { %1407 = vst.msk [vmem:[#allocation2 + $0x7] sm:$0x1] %vm382_vm0, %v1312_v10  ;;  %641 = vst.msk [vmem:[#allocation2 + $0x11] sm:$0x1] %vm382_vm0, %v548_v11 }
 0x184   :  { %1069 = vrot.lane.b32.xlu0 %v446_v59, %s4745_s21  ;;  %689 = vrot.lane.b32.xlu1 %v5101_v60, %s4740_s0 }
 0x186   :  { %v674_v14 = vpop.permute.xlu1 %673  ;;  %v546_v15 = vpop.permute.xlu0 %545 }
 0x187   :  { %768 = vst.msk [vmem:[#allocation2 + $0xa] sm:$0x1] %vm382_vm0, %v674_v14  ;;  %640 = vst.msk [vmem:[#allocation2 + $0x9] sm:$0x1] %vm382_vm0, %v546_v15  ;;  %v5297_v15 = vrot.slane %v5011_v48, %v4906_v8 }
 0x188   :  { %1325 = vrot.lane.b32.xlu0 %v446_v59, %s4746_s22  ;;  %945 = vrot.lane.b32.xlu1 %v5101_v60, %s4742_s18 }
 0x18a   :  { %v930_v62 = vpop.permute.xlu1 %929  ;;  %v552_v21 = vpop.permute.xlu0 %551 }
 0x18b   :  { %1024 = vst.msk [vmem:[#allocation2 + $0xc] sm:$0x1] %vm382_vm0, %v930_v62  ;;  %643 = vst.msk [vmem:[#allocation2 + $0x21] sm:$0x1] %vm382_vm0, %v552_v21 }
 0x18c   :  { %817 = vrot.lane.b32.xlu0 %v5101_v60, %s4743_s19  ;;  %1201 = vrot.lane.b32.xlu1 %v5101_v60, %s4744_s20 }
 0x18e   :  { %v1186_v29 = vpop.permute.xlu1 %1185  ;;  %v802_v1 = vpop.permute.xlu0 %801 }
 0x18f   :  { %1280 = vst.msk [vmem:[#allocation2 + $0xe] sm:$0x1] %vm382_vm0, %v1186_v29  ;;  %896 = vst.msk [vmem:[#allocation2 + $0xb] sm:$0x1] %vm382_vm0, %v802_v1 }
 0x190   :  { %1073 = vrot.lane.b32.xlu0 %v5101_v60, %s4745_s21  ;;  %691 = vrot.lane.b32.xlu1 %v5108_v61, %s4740_s0 }
 0x192   :  { %v676_v35 = vpop.permute.xlu1 %675  ;;  %v1058_v36 = vpop.permute.xlu0 %1057 }
 0x193   :  { %769 = vst.msk [vmem:[#allocation2 + $0x12] sm:$0x1] %vm382_vm0, %v676_v35  ;;  %1152 = vst.msk [vmem:[#allocation2 + $0xd] sm:$0x1] %vm382_vm0, %v1058_v36 }
 0x194   :  { %1329 = vrot.lane.b32.xlu0 %v5101_v60, %s4746_s22  ;;  %947 = vrot.lane.b32.xlu1 %v5108_v61, %s4742_s18 }
 0x196   :  { %v932_v37 = vpop.permute.xlu1 %931  ;;  %v1314_v38 = vpop.permute.xlu0 %1313 }
 0x197   :  { %1025 = vst.msk [vmem:[#allocation2 + $0x14] sm:$0x1] %vm382_vm0, %v932_v37  ;;  %1408 = vst.msk [vmem:[#allocation2 + $0xf] sm:$0x1] %vm382_vm0, %v1314_v38  ;;  %v486_v38 = vrot.slane %v5014_v49, %v4906_v8 }
 0x198   :  { %819 = vrot.lane.b32.xlu0 %v5108_v61, %s4743_s19  ;;  %1203 = vrot.lane.b32.xlu1 %v5108_v61, %s4744_s20 }
 0x19a   :  { %v1188_v39 = vpop.permute.xlu1 %1187  ;;  %v804_v40 = vpop.permute.xlu0 %803 }
 0x19b   :  { %1281 = vst.msk [vmem:[#allocation2 + $0x16] sm:$0x1] %vm382_vm0, %v1188_v39  ;;  %897 = vst.msk [vmem:[#allocation2 + $0x13] sm:$0x1] %vm382_vm0, %v804_v40 }
 0x19c   :  { %1075 = vrot.lane.b32.xlu0 %v5108_v61, %s4745_s21  ;;  %695 = vrot.lane.b32.xlu1 %v5117_v2, %s4740_s0 }
 0x19e   :  { %v680_v41 = vpop.permute.xlu1 %679  ;;  %v1060_v42 = vpop.permute.xlu0 %1059 }
 0x19f   :  { %771 = vst.msk [vmem:[#allocation2 + $0x22] sm:$0x1] %vm382_vm0, %v680_v41  ;;  %1153 = vst.msk [vmem:[#allocation2 + $0x15] sm:$0x1] %vm382_vm0, %v1060_v42 }
 0x1a0   :  { %1331 = vrot.lane.b32.xlu0 %v5108_v61, %s4746_s22  ;;  %823 = vrot.lane.b32.xlu1 %v5117_v2, %s4743_s19  ;;  %v470_v61 = vrot.slane %v4953_v30, %v4906_v8 }
 0x1a2   :  { %v936_v44 = vpop.permute.xlu1 %935  ;;  %v1316_v45 = vpop.permute.xlu0 %1315 }
 0x1a3   :  { %1027 = vst.msk [vmem:[#allocation2 + $0x24] sm:$0x1] %vm382_vm0, %v936_v44  ;;  %1409 = vst.msk [vmem:[#allocation2 + $0x17] sm:$0x1] %vm382_vm0, %v1316_v45 }
 0x1a4   :  { %571 = vrot.lane.b32.xlu0 %v5223_v43, %s4741_s3  ;;  %951 = vrot.lane.b32.xlu1 %v5117_v2, %s4742_s18 }
 0x1a6   :  { %v1192_v55 = vpop.permute.xlu1 %1191  ;;  %v808_v56 = vpop.permute.xlu0 %807 }
 0x1a7   :  { %1283 = vst.msk [vmem:[#allocation2 + $0x26] sm:$0x1] %vm382_vm0, %v1192_v55  ;;  %899 = vst.msk [vmem:[#allocation2 + $0x23] sm:$0x1] %vm382_vm0, %v808_v56 }
 0x1a8   :  { %575 = vrot.lane.b32.xlu0 %v5229_v47, %s4741_s3  ;;  %1079 = vrot.lane.b32.xlu1 %v5117_v2, %s4745_s21 }
 0x1aa   :  { %v550_v46 = vpop.permute.xlu1 %549  ;;  %v1064_v57 = vpop.permute.xlu0 %1063 }
 0x1ab   :  { %642 = vst.msk [vmem:[#allocation2 + $0x19] sm:$0x1] %vm382_vm0, %v550_v46  ;;  %1155 = vst.msk [vmem:[#allocation2 + $0x25] sm:$0x1] %vm382_vm0, %v1064_v57  ;;  %v494_v46 = vrot.slane %v5031_v53, %v4906_v8  ;;  %v5371_v57 = vrot.slane %v5027_v52, %v4906_v8  ;;  %v5384_v53 = vrot.slane %v5023_v51, %v4906_v8 }
 0x1ac   :  { %821 = vrot.lane.b32.xlu0 %v462_v32, %s4743_s19  ;;  %1207 = vrot.lane.b32.xlu1 %v5117_v2, %s4744_s20  ;;  %v5403_v51 = vrot.slane %v5148_v24, %v4906_v8 }
 0x1ae   :  { %v1320_v58 = vpop.permute.xlu0 %1319  ;;  %v554_v59 = vpop.permute.xlu1 %553 }
 0x1af   :  { %1411 = vst.msk [vmem:[#allocation2 + $0x27] sm:$0x1] %vm382_vm0, %v1320_v58  ;;  %644 = vst.msk [vmem:[#allocation2 + $0x29] sm:$0x1] %vm382_vm0, %v554_v59 }
 0x1b0   :  { %1077 = vrot.lane.b32.xlu0 %v462_v32, %s4745_s21  ;;  %1335 = vrot.lane.b32.xlu1 %v5117_v2, %s4746_s22 }
 0x1b2   :  { %v556_v33 = vpop.permute.xlu0 %555  ;;  %v678_v60 = vpop.permute.xlu1 %677 }
 0x1b3   :  { %645 = vst.msk [vmem:[#allocation2 + $0x31] sm:$0x1] %vm382_vm0, %v556_v33  ;;  %770 = vst.msk [vmem:[#allocation2 + $0x1a] sm:$0x1] %vm382_vm0, %v678_v60  ;;  %v5377_v33 = vrot.slane %v5142_v20, %v4906_v8  ;;  %v5394_v20 = vrot.slane %v5043_v54, %v4906_v8 }
 0x1b4   :  { %1333 = vrot.lane.b32.xlu0 %v462_v32, %s4746_s22  ;;  %565 = vrot.lane.b32.xlu1 %v462_v32, %s4741_s3 }
 0x1b6   :  { %v560_v63 = vpop.permute.xlu0 %559  ;;  %v934_v0 = vpop.permute.xlu1 %933 }
 0x1b7   :  { %647 = vst.msk [vmem:[#allocation2 + $0x41] sm:$0x1] %vm382_vm0, %v560_v63  ;;  %1026 = vst.msk [vmem:[#allocation2 + $0x1c] sm:$0x1] %vm382_vm0, %v934_v0  ;;  %v5407_v0 = vrot.slane %v5152_v25, %v4906_v8 }
 0x1b8   :  { %697 = vrot.lane.b32.xlu0 %v470_v61, %s4740_s0  ;;  %569 = vrot.lane.b32.xlu1 %v470_v61, %s4741_s3 }
 0x1ba   :  { %v806_v2 = vpop.permute.xlu0 %805  ;;  %v1190_v3 = vpop.permute.xlu1 %1189 }
 0x1bb   :  { %898 = vst.msk [vmem:[#allocation2 + $0x1b] sm:$0x1] %vm382_vm0, %v806_v2  ;;  %1282 = vst.msk [vmem:[#allocation2 + $0x1e] sm:$0x1] %vm382_vm0, %v1190_v3 }
 0x1bc   :  { %825 = vrot.lane.b32.xlu0 %v470_v61, %s4743_s19  ;;  %693 = vrot.lane.b32.xlu1 %v462_v32, %s4740_s0 }
 0x1be   :  { %v1062_v30 = vpop.permute.xlu0 %1061  ;;  %v682_v4 = vpop.permute.xlu1 %681 }
 0x1bf   :  { %1154 = vst.msk [vmem:[#allocation2 + $0x1d] sm:$0x1] %vm382_vm0, %v1062_v30  ;;  %772 = vst.msk [vmem:[#allocation2 + $0x2a] sm:$0x1] %vm382_vm0, %v682_v4 }
 0x1c0   :  { %953 = vrot.lane.b32.xlu0 %v470_v61, %s4742_s18  ;;  %949 = vrot.lane.b32.xlu1 %v462_v32, %s4742_s18 }
 0x1c2   :  { %v1318_v5 = vpop.permute.xlu0 %1317  ;;  %v938_v6 = vpop.permute.xlu1 %937 }
 0x1c3   :  { %1410 = vst.msk [vmem:[#allocation2 + $0x1f] sm:$0x1] %vm382_vm0, %v1318_v5  ;;  %1028 = vst.msk [vmem:[#allocation2 + $0x2c] sm:$0x1] %vm382_vm0, %v938_v6 }
 0x1c4   :  { %1081 = vrot.lane.b32.xlu0 %v470_v61, %s4745_s21  ;;  %1205 = vrot.lane.b32.xlu1 %v462_v32, %s4744_s20 }
 0x1c6   :  { %v810_v7 = vpop.permute.xlu0 %809  ;;  %v1194_v9 = vpop.permute.xlu1 %1193 }
 0x1c7   :  { %900 = vst.msk [vmem:[#allocation2 + $0x2b] sm:$0x1] %vm382_vm0, %v810_v7  ;;  %1284 = vst.msk [vmem:[#allocation2 + $0x2e] sm:$0x1] %vm382_vm0, %v1194_v9 }
 0x1c8   :  { %1209 = vrot.lane.b32.xlu0 %v470_v61, %s4744_s20  ;;  %699 = vrot.lane.b32.xlu1 %v5223_v43, %s4740_s0 }
 0x1ca   :  { %v1066_v10 = vpop.permute.xlu0 %1065  ;;  %v684_v11 = vpop.permute.xlu1 %683 }
 0x1cb   :  { %1156 = vst.msk [vmem:[#allocation2 + $0x2d] sm:$0x1] %vm382_vm0, %v1066_v10  ;;  %773 = vst.msk [vmem:[#allocation2 + $0x32] sm:$0x1] %vm382_vm0, %v684_v11 }
 0x1cc   :  { %1337 = vrot.lane.b32.xlu0 %v470_v61, %s4746_s22  ;;  %827 = vrot.lane.b32.xlu1 %v5223_v43, %s4743_s19 }
 0x1ce   :  { %v1322_v13 = vpop.permute.xlu0 %1321  ;;  %v940_v14 = vpop.permute.xlu1 %939 }
 0x1cf   :  { %1412 = vst.msk [vmem:[#allocation2 + $0x2f] sm:$0x1] %vm382_vm0, %v1322_v13  ;;  %1029 = vst.msk [vmem:[#allocation2 + $0x34] sm:$0x1] %vm382_vm0, %v940_v14 }
 0x1d0   :  { %579 = vrot.lane.b32.xlu0 %v5287_v12, %s4741_s3  ;;  %955 = vrot.lane.b32.xlu1 %v5223_v43, %s4742_s18 }
 0x1d2   :  { %v812_v16 = vpop.permute.xlu0 %811  ;;  %v1196_v17 = vpop.permute.xlu1 %1195 }
 0x1d3   :  { %901 = vst.msk [vmem:[#allocation2 + $0x33] sm:$0x1] %vm382_vm0, %v812_v16  ;;  %1285 = vst.msk [vmem:[#allocation2 + $0x36] sm:$0x1] %vm382_vm0, %v1196_v17 }
 0x1d4   :  { %583 = vrot.lane.b32.xlu0 %v5297_v15, %s4741_s3  ;;  %1083 = vrot.lane.b32.xlu1 %v5223_v43, %s4745_s21 }
 0x1d6   :  { %v1068_v18 = vpop.permute.xlu0 %1067  ;;  %v688_v19 = vpop.permute.xlu1 %687 }
 0x1d7   :  { %1157 = vst.msk [vmem:[#allocation2 + $0x35] sm:$0x1] %vm382_vm0, %v1068_v18  ;;  %775 = vst.msk [vmem:[#allocation2 + $0x42] sm:$0x1] %vm382_vm0, %v688_v19 }
 0x1d8   :  { %701 = vrot.lane.b32.xlu0 %v478_v50, %s4740_s0  ;;  %1211 = vrot.lane.b32.xlu1 %v5223_v43, %s4744_s20 }
 0x1da   :  { %v1324_v48 = vpop.permute.xlu0 %1323  ;;  %v944_v62 = vpop.permute.xlu1 %943 }
 0x1db   :  { %1413 = vst.msk [vmem:[#allocation2 + $0x37] sm:$0x1] %vm382_vm0, %v1324_v48  ;;  %1031 = vst.msk [vmem:[#allocation2 + $0x44] sm:$0x1] %vm382_vm0, %v944_v62 }
 0x1dc   :  { %829 = vrot.lane.b32.xlu0 %v478_v50, %s4743_s19  ;;  %1339 = vrot.lane.b32.xlu1 %v5223_v43, %s4746_s22 }
 0x1de   :  { %v816_v34 = vpop.permute.xlu0 %815  ;;  %v1200_v21 = vpop.permute.xlu1 %1199 }
 0x1df   :  { %903 = vst.msk [vmem:[#allocation2 + $0x43] sm:$0x1] %vm382_vm0, %v816_v34  ;;  %1287 = vst.msk [vmem:[#allocation2 + $0x46] sm:$0x1] %vm382_vm0, %v1200_v21 }
 0x1e0   :  { %957 = vrot.lane.b32.xlu0 %v478_v50, %s4742_s18  ;;  %703 = vrot.lane.b32.xlu1 %v5229_v47, %s4740_s0 }
 0x1e2   :  { %v1072_v22 = vpop.permute.xlu0 %1071  ;;  %v558_v29 = vpop.permute.xlu1 %557 }
 0x1e3   :  { %1159 = vst.msk [vmem:[#allocation2 + $0x45] sm:$0x1] %vm382_vm0, %v1072_v22  ;;  %646 = vst.msk [vmem:[#allocation2 + $0x39] sm:$0x1] %vm382_vm0, %v558_v29 }
 0x1e4   :  { %1085 = vrot.lane.b32.xlu0 %v478_v50, %s4745_s21  ;;  %831 = vrot.lane.b32.xlu1 %v5229_v47, %s4743_s19 }
 0x1e6   :  { %v1328_v1 = vpop.permute.xlu0 %1327  ;;  %v562_v35 = vpop.permute.xlu1 %561 }
 0x1e7   :  { %1415 = vst.msk [vmem:[#allocation2 + $0x47] sm:$0x1] %vm382_vm0, %v1328_v1  ;;  %648 = vst.msk [vmem:[#allocation2 + $0x49] sm:$0x1] %vm382_vm0, %v562_v35 }
 0x1e8   :  { %1213 = vrot.lane.b32.xlu0 %v478_v50, %s4744_s20  ;;  %959 = vrot.lane.b32.xlu1 %v5229_v47, %s4742_s18 }
 0x1ea   :  { %v564_v36 = vpop.permute.xlu0 %563  ;;  %v686_v37 = vpop.permute.xlu1 %685 }
 0x1eb   :  { %649 = vst.msk [vmem:[#allocation2 + $0x51] sm:$0x1] %vm382_vm0, %v564_v36  ;;  %774 = vst.msk [vmem:[#allocation2 + $0x3a] sm:$0x1] %vm382_vm0, %v686_v37 }
 0x1ec   :  { %1341 = vrot.lane.b32.xlu0 %v478_v50, %s4746_s22  ;;  %1087 = vrot.lane.b32.xlu1 %v5229_v47, %s4745_s21 }
 0x1ee   :  { %v568_v39 = vpop.permute.xlu0 %567  ;;  %v942_v40 = vpop.permute.xlu1 %941 }
 0x1ef   :  { %651 = vst.msk [vmem:[#allocation2 + $0x61] sm:$0x1] %vm382_vm0, %v568_v39  ;;  %1030 = vst.msk [vmem:[#allocation2 + $0x3c] sm:$0x1] %vm382_vm0, %v942_v40 }
 0x1f0   :  { %705 = vrot.lane.b32.xlu0 %v486_v38, %s4740_s0  ;;  %1215 = vrot.lane.b32.xlu1 %v5229_v47, %s4744_s20 }
 0x1f2   :  { %v814_v41 = vpop.permute.xlu0 %813  ;;  %v1198_v42 = vpop.permute.xlu1 %1197 }
 0x1f3   :  { %902 = vst.msk [vmem:[#allocation2 + $0x3b] sm:$0x1] %vm382_vm0, %v814_v41  ;;  %1286 = vst.msk [vmem:[#allocation2 + $0x3e] sm:$0x1] %vm382_vm0, %v1198_v42 }
 0x1f4   :  { %833 = vrot.lane.b32.xlu0 %v486_v38, %s4743_s19  ;;  %1343 = vrot.lane.b32.xlu1 %v5229_v47, %s4746_s22 }
 0x1f6   :  { %v1070_v49 = vpop.permute.xlu0 %1069  ;;  %v690_v43 = vpop.permute.xlu1 %689 }
 0x1f7   :  { %1158 = vst.msk [vmem:[#allocation2 + $0x3d] sm:$0x1] %vm382_vm0, %v1070_v49  ;;  %776 = vst.msk [vmem:[#allocation2 + $0x4a] sm:$0x1] %vm382_vm0, %v690_v43 }
 0x1f8   :  { %961 = vrot.lane.b32.xlu0 %v486_v38, %s4742_s18  ;;  %573 = vrot.lane.b32.xlu1 %v478_v50, %s4741_s3 }
 0x1fa   :  { %v1326_v44 = vpop.permute.xlu0 %1325  ;;  %v946_v45 = vpop.permute.xlu1 %945 }
 0x1fb   :  { %1414 = vst.msk [vmem:[#allocation2 + $0x3f] sm:$0x1] %vm382_vm0, %v1326_v44  ;;  %1032 = vst.msk [vmem:[#allocation2 + $0x4c] sm:$0x1] %vm382_vm0, %v946_v45  ;;  %v5508_v45 = vld [vmem:[#allocation2] sm:$0xff] }
 0x1fc   :  { %1089 = vrot.lane.b32.xlu0 %v486_v38, %s4745_s21  ;;  %577 = vrot.lane.b32.xlu1 %v486_v38, %s4741_s3 }
 0x1fe   :  { %v818_v47 = vpop.permute.xlu0 %817  ;;  %v1202_v55 = vpop.permute.xlu1 %1201 }
 0x1ff   :  { %904 = vst.msk [vmem:[#allocation2 + $0x4b] sm:$0x1] %vm382_vm0, %v818_v47  ;;  %1288 = vst.msk [vmem:[#allocation2 + $0x4e] sm:$0x1] %vm382_vm0, %v1202_v55 }
 0x200   :  { %1217 = vrot.lane.b32.xlu0 %v486_v38, %s4744_s20  ;;  %707 = vrot.lane.b32.xlu1 %v5287_v12, %s4740_s0 }
 0x202   :  { %v1074_v56 = vpop.permute.xlu0 %1073  ;;  %v692_v32 = vpop.permute.xlu1 %691 }
 0x203   :  { %1160 = vst.msk [vmem:[#allocation2 + $0x4d] sm:$0x1] %vm382_vm0, %v1074_v56  ;;  %777 = vst.msk [vmem:[#allocation2 + $0x52] sm:$0x1] %vm382_vm0, %v692_v32  ;;  %v1472_v56 = vsel %vm1471_vm1, %v5508_v45, -inf }
 0x204   :  { %1345 = vrot.lane.b32.xlu0 %v486_v38, %s4746_s22  ;;  %835 = vrot.lane.b32.xlu1 %v5287_v12, %s4743_s19 }
 0x206   :  { %v1330_v58 = vpop.permute.xlu0 %1329  ;;  %v948_v59 = vpop.permute.xlu1 %947 }
 0x207   :  { %1416 = vst.msk [vmem:[#allocation2 + $0x4f] sm:$0x1] %vm382_vm0, %v1330_v58  ;;  %1033 = vst.msk [vmem:[#allocation2 + $0x54] sm:$0x1] %vm382_vm0, %v948_v59 }
 0x208   :  { %587 = vrot.lane.b32.xlu0 %v5371_v57, %s4741_s3  ;;  %581 = vrot.lane.b32.xlu1 %v494_v46, %s4741_s3 }
 0x20a   :  { %v820_v52 = vpop.permute.xlu0 %819  ;;  %v1204_v60 = vpop.permute.xlu1 %1203 }
 0x20b   :  { %905 = vst.msk [vmem:[#allocation2 + $0x53] sm:$0x1] %vm382_vm0, %v820_v52  ;;  %1289 = vst.msk [vmem:[#allocation2 + $0x56] sm:$0x1] %vm382_vm0, %v1204_v60 }
 0x20c   :  { %591 = vrot.lane.b32.xlu0 %v5377_v33, %s4741_s3  ;;  %585 = vrot.lane.b32.xlu1 %v5384_v53, %s4741_s3 }
 0x20e   :  { %v1076_v61 = vpop.permute.xlu0 %1075  ;;  %v696_v63 = vpop.permute.xlu1 %695 }
 0x20f   :  { %1161 = vst.msk [vmem:[#allocation2 + $0x55] sm:$0x1] %vm382_vm0, %v1076_v61  ;;  %779 = vst.msk [vmem:[#allocation2 + $0x62] sm:$0x1] %vm382_vm0, %v696_v63 }
 0x210   :  { %709 = vrot.lane.b32.xlu0 %v494_v46, %s4740_s0  ;;  %589 = vrot.lane.b32.xlu1 %v5394_v20, %s4741_s3 }
 0x212   :  { %v1332_v54 = vpop.permute.xlu0 %1331  ;;  %v824_v2 = vpop.permute.xlu1 %823 }
 0x213   :  { %1417 = vst.msk [vmem:[#allocation2 + $0x57] sm:$0x1] %vm382_vm0, %v1332_v54  ;;  %907 = vst.msk [vmem:[#allocation2 + $0x63] sm:$0x1] %vm382_vm0, %v824_v2 }
 0x214   :  { %595 = vrot.lane.b32.xlu0 %v5407_v0, %s4741_s3  ;;  %593 = vrot.lane.b32.xlu1 %v5403_v51, %s4741_s3 }
 0x216   :  { %v572_v3 = vpop.permute.xlu0 %571  ;;  %v952_v30 = vpop.permute.xlu1 %951 }
 0x217   :  { %653 = vst.msk [vmem:[#allocation2 + $0x71] sm:$0x1] %vm382_vm0, %v572_v3  ;;  %1035 = vst.msk [vmem:[#allocation2 + $0x64] sm:$0x1] %vm382_vm0, %v952_v30 }
 0x218   :  { %837 = vrot.lane.b32.xlu0 %v494_v46, %s4743_s19  ;;  %963 = vrot.lane.b32.xlu1 %v5287_v12, %s4742_s18 }
 0x21a   :  { %v576_v24 = vpop.permute.xlu0 %575  ;;  %v1080_v25 = vpop.permute.xlu1 %1079 }
 0x21b   :  { %655 = vst.msk [vmem:[#allocation2 + $0x81] sm:$0x1] %vm382_vm0, %v576_v24  ;;  %1163 = vst.msk [vmem:[#allocation2 + $0x65] sm:$0x1] %vm382_vm0, %v1080_v25 }
 0x21c   :  { %965 = vrot.lane.b32.xlu0 %v494_v46, %s4742_s18  ;;  %1091 = vrot.lane.b32.xlu1 %v5287_v12, %s4745_s21 }
 0x21e   :  { %v822_v4 = vpop.permute.xlu0 %821  ;;  %v1208_v5 = vpop.permute.xlu1 %1207 }
 0x21f   :  { %906 = vst.msk [vmem:[#allocation2 + $0x5b] sm:$0x1] %vm382_vm0, %v822_v4  ;;  %1291 = vst.msk [vmem:[#allocation2 + $0x66] sm:$0x1] %vm382_vm0, %v1208_v5  ;;  %v5548_v5 = vld [vmem:[#allocation2 + $0x8] sm:$0xff] }
 0x220   :  { %1093 = vrot.lane.b32.xlu0 %v494_v46, %s4745_s21  ;;  %1219 = vrot.lane.b32.xlu1 %v5287_v12, %s4744_s20 }
 0x222   :  { %v1078_v6 = vpop.permute.xlu0 %1077  ;;  %v1336_v7 = vpop.permute.xlu1 %1335 }
 0x223   :  { %1162 = vst.msk [vmem:[#allocation2 + $0x5d] sm:$0x1] %vm382_vm0, %v1078_v6  ;;  %1419 = vst.msk [vmem:[#allocation2 + $0x67] sm:$0x1] %vm382_vm0, %v1336_v7 }
 0x224   :  { %1221 = vrot.lane.b32.xlu0 %v494_v46, %s4744_s20  ;;  %1347 = vrot.lane.b32.xlu1 %v5287_v12, %s4746_s22 }
 0x226   :  { %v1334_v9 = vpop.permute.xlu0 %1333  ;;  %v566_v10 = vpop.permute.xlu1 %565 }
 0x227   :  { %1418 = vst.msk [vmem:[#allocation2 + $0x5f] sm:$0x1] %vm382_vm0, %v1334_v9  ;;  %650 = vst.msk [vmem:[#allocation2 + $0x59] sm:$0x1] %vm382_vm0, %v566_v10  ;;  %v1475_v9 = vsel %vm1471_vm1, %v5548_v5, -inf }
 0x228   :  { %1349 = vrot.lane.b32.xlu0 %v494_v46, %s4746_s22  ;;  %711 = vrot.lane.b32.xlu1 %v5297_v15, %s4740_s0 }
 0x22a   :  { %v698_v11 = vpop.permute.xlu0 %697  ;;  %v570_v13 = vpop.permute.xlu1 %569 }
 0x22b   :  { %780 = vst.msk [vmem:[#allocation2 + $0x6a] sm:$0x1] %vm382_vm0, %v698_v11  ;;  %652 = vst.msk [vmem:[#allocation2 + $0x69] sm:$0x1] %vm382_vm0, %v570_v13 }
 0x22c   :  { %713 = vrot.lane.b32.xlu0 %v5384_v53, %s4740_s0  ;;  %839 = vrot.lane.b32.xlu1 %v5297_v15, %s4743_s19 }
 0x22e   :  { %v826_v12 = vpop.permute.xlu0 %825  ;;  %v694_v14 = vpop.permute.xlu1 %693 }
 0x22f   :  { %908 = vst.msk [vmem:[#allocation2 + $0x6b] sm:$0x1] %vm382_vm0, %v826_v12  ;;  %778 = vst.msk [vmem:[#allocation2 + $0x5a] sm:$0x1] %vm382_vm0, %v694_v14 }
 0x230   :  { %841 = vrot.lane.b32.xlu0 %v5384_v53, %s4743_s19  ;;  %967 = vrot.lane.b32.xlu1 %v5297_v15, %s4742_s18 }
 0x232   :  { %v954_v16 = vpop.permute.xlu0 %953  ;;  %v950_v17 = vpop.permute.xlu1 %949 }
 0x233   :  { %1036 = vst.msk [vmem:[#allocation2 + $0x6c] sm:$0x1] %vm382_vm0, %v954_v16  ;;  %1034 = vst.msk [vmem:[#allocation2 + $0x5c] sm:$0x1] %vm382_vm0, %v950_v17 }
 0x234   :  { %969 = vrot.lane.b32.xlu0 %v5384_v53, %s4742_s18  ;;  %1095 = vrot.lane.b32.xlu1 %v5297_v15, %s4745_s21 }
 0x236   :  { %v1082_v50 = vpop.permute.xlu0 %1081  ;;  %v1206_v18 = vpop.permute.xlu1 %1205 }
 0x237   :  { %1164 = vst.msk [vmem:[#allocation2 + $0x6d] sm:$0x1] %vm382_vm0, %v1082_v50  ;;  %1290 = vst.msk [vmem:[#allocation2 + $0x5e] sm:$0x1] %vm382_vm0, %v1206_v18 }
 0x238   :  { %1097 = vrot.lane.b32.xlu0 %v5384_v53, %s4745_s21  ;;  %1223 = vrot.lane.b32.xlu1 %v5297_v15, %s4744_s20 }
 0x23a   :  { %v1210_v19 = vpop.permute.xlu0 %1209  ;;  %v700_v48 = vpop.permute.xlu1 %699 }
 0x23b   :  { %1292 = vst.msk [vmem:[#allocation2 + $0x6e] sm:$0x1] %vm382_vm0, %v1210_v19  ;;  %781 = vst.msk [vmem:[#allocation2 + $0x72] sm:$0x1] %vm382_vm0, %v700_v48 }
 0x23c   :  { %1225 = vrot.lane.b32.xlu0 %v5384_v53, %s4744_s20  ;;  %1351 = vrot.lane.b32.xlu1 %v5297_v15, %s4746_s22 }
 0x23e   :  { %v1338_v62 = vpop.permute.xlu0 %1337  ;;  %v828_v34 = vpop.permute.xlu1 %827 }
 0x23f   :  { %1420 = vst.msk [vmem:[#allocation2 + $0x6f] sm:$0x1] %vm382_vm0, %v1338_v62  ;;  %909 = vst.msk [vmem:[#allocation2 + $0x73] sm:$0x1] %vm382_vm0, %v828_v34  ;;  %v526_v62 = vrot.slane %v5171_v28, %v4906_v8 }
 0x240   :  { %1353 = vrot.lane.b32.xlu0 %v5384_v53, %s4746_s22  ;;  %1229 = vrot.lane.b32.xlu1 %v5394_v20, %s4744_s20 }
 0x242   :  { %v580_v21 = vpop.permute.xlu0 %579  ;;  %v956_v22 = vpop.permute.xlu1 %955 }
 0x243   :  { %657 = vst.msk [vmem:[#allocation2 + $0x91] sm:$0x1] %vm382_vm0, %v580_v21  ;;  %1037 = vst.msk [vmem:[#allocation2 + $0x74] sm:$0x1] %vm382_vm0, %v956_v22 }
 0x244   :  { %715 = vrot.lane.b32.xlu0 %v5371_v57, %s4740_s0 }
 0x246   :  { %v584_v15 = vpop.permute.xlu0 %583  ;;  %v1084_v29 = vpop.permute.xlu1 %1083 }
 0x247   :  { %659 = vst.msk [vmem:[#allocation2 + $0xa1] sm:$0x1] %vm382_vm0, %v584_v15  ;;  %1165 = vst.msk [vmem:[#allocation2 + $0x75] sm:$0x1] %vm382_vm0, %v1084_v29 }
 0x248   :  { %717 = vrot.lane.b32.xlu0 %v5394_v20, %s4740_s0 }
 0x24a   :  { %v702_v1 = vpop.permute.xlu0 %701  ;;  %v1212_v35 = vpop.permute.xlu1 %1211 }
 0x24b   :  { %782 = vst.msk [vmem:[#allocation2 + $0x7a] sm:$0x1] %vm382_vm0, %v702_v1  ;;  %1293 = vst.msk [vmem:[#allocation2 + $0x76] sm:$0x1] %vm382_vm0, %v1212_v35 }
 0x24c   :  { %843 = vrot.lane.b32.xlu0 %v5371_v57, %s4743_s19 }
 0x24e   :  { %v830_v36 = vpop.permute.xlu0 %829  ;;  %v1340_v37 = vpop.permute.xlu1 %1339 }
 0x24f   :  { %910 = vst.msk [vmem:[#allocation2 + $0x7b] sm:$0x1] %vm382_vm0, %v830_v36  ;;  %1421 = vst.msk [vmem:[#allocation2 + $0x77] sm:$0x1] %vm382_vm0, %v1340_v37  ;;  %v5602_v37 = vld [vmem:[#allocation2 + $0x10] sm:$0xff] }
 0x250   :  { %845 = vrot.lane.b32.xlu0 %v5394_v20, %s4743_s19 }
 0x252   :  { %v958_v38 = vpop.permute.xlu0 %957  ;;  %v704_v39 = vpop.permute.xlu1 %703 }
 0x253   :  { %1038 = vst.msk [vmem:[#allocation2 + $0x7c] sm:$0x1] %vm382_vm0, %v958_v38  ;;  %783 = vst.msk [vmem:[#allocation2 + $0x82] sm:$0x1] %vm382_vm0, %v704_v39  ;;  %v1478_v39 = vsel %vm1471_vm1, %v5602_v37, -inf }
 0x254   :  { %971 = vrot.lane.b32.xlu0 %v5371_v57, %s4742_s18 }
 0x256   :  { %v1086_v40 = vpop.permute.xlu0 %1085  ;;  %v832_v41 = vpop.permute.xlu1 %831 }
 0x257   :  { %1166 = vst.msk [vmem:[#allocation2 + $0x7d] sm:$0x1] %vm382_vm0, %v1086_v40  ;;  %911 = vst.msk [vmem:[#allocation2 + $0x83] sm:$0x1] %vm382_vm0, %v832_v41 }
 0x258   :  { %973 = vrot.lane.b32.xlu0 %v5394_v20, %s4742_s18 }
 0x25a   :  { %v1214_v42 = vpop.permute.xlu0 %1213  ;;  %v960_v49 = vpop.permute.xlu1 %959 }
 0x25b   :  { %1294 = vst.msk [vmem:[#allocation2 + $0x7e] sm:$0x1] %vm382_vm0, %v1214_v42  ;;  %1039 = vst.msk [vmem:[#allocation2 + $0x84] sm:$0x1] %vm382_vm0, %v960_v49 }
 0x25c   :  { %1099 = vrot.lane.b32.xlu0 %v5371_v57, %s4745_s21 }
 0x25e   :  { %v1342_v43 = vpop.permute.xlu0 %1341  ;;  %v1088_v44 = vpop.permute.xlu1 %1087 }
 0x25f   :  { %1422 = vst.msk [vmem:[#allocation2 + $0x7f] sm:$0x1] %vm382_vm0, %v1342_v43  ;;  %1167 = vst.msk [vmem:[#allocation2 + $0x85] sm:$0x1] %vm382_vm0, %v1088_v44  ;;  %v530_v44 = vrot.slane %v5145_v23, %v4906_v8  ;;  %v5634_v23 = vld [vmem:[#allocation2 + $0x18] sm:$0xff] }
 0x260   :  { %1101 = vrot.lane.b32.xlu0 %v5394_v20, %s4745_s21 }
 0x262   :  { %v706_v47 = vpop.permute.xlu0 %705  ;;  %v1216_v55 = vpop.permute.xlu1 %1215 }
 0x263   :  { %784 = vst.msk [vmem:[#allocation2 + $0x8a] sm:$0x1] %vm382_vm0, %v706_v47  ;;  %1295 = vst.msk [vmem:[#allocation2 + $0x86] sm:$0x1] %vm382_vm0, %v1216_v55  ;;  %v534_v55 = vrot.slane %v5163_v26, %v4906_v8  ;;  %v1481_v26 = vsel %vm1471_vm1, %v5634_v23, -inf }
 0x264   :  { %1227 = vrot.lane.b32.xlu0 %v5371_v57, %s4744_s20  ;;  %1473 = vmax.xlane.f32.xlu1 %v1472_v56 }
 0x266   :  { %v834_v32 = vpop.permute.xlu0 %833  ;;  %v1344_v46 = vpop.permute.xlu1 %1343 }
 0x267   :  { %912 = vst.msk [vmem:[#allocation2 + $0x8b] sm:$0x1] %vm382_vm0, %v834_v32  ;;  %1423 = vst.msk [vmem:[#allocation2 + $0x87] sm:$0x1] %vm382_vm0, %v1344_v46 }
 0x268   :  { %1355 = vrot.lane.b32.xlu0 %v5371_v57, %s4746_s22 }
 0x26a   :  { %v962_v58 = vpop.permute.xlu0 %961  ;;  %v574_v59 = vpop.permute.xlu1 %573 }
 0x26b   :  { %1040 = vst.msk [vmem:[#allocation2 + $0x8c] sm:$0x1] %vm382_vm0, %v962_v58  ;;  %654 = vst.msk [vmem:[#allocation2 + $0x79] sm:$0x1] %vm382_vm0, %v574_v59 }
 0x26c   :  { %1357 = vrot.lane.b32.xlu0 %v5394_v20, %s4746_s22 }
 0x26e   :  { %v1090_v53 = vpop.permute.xlu0 %1089  ;;  %v578_v52 = vpop.permute.xlu1 %577 }
 0x26f   :  { %1168 = vst.msk [vmem:[#allocation2 + $0x8d] sm:$0x1] %vm382_vm0, %v1090_v53  ;;  %656 = vst.msk [vmem:[#allocation2 + $0x89] sm:$0x1] %vm382_vm0, %v578_v52 }
 0x272   :  { %v1218_v60 = vpop.permute.xlu0 %1217  ;;  %v708_v61 = vpop.permute.xlu1 %707 }
 0x273   :  { %1296 = vst.msk [vmem:[#allocation2 + $0x8e] sm:$0x1] %vm382_vm0, %v1218_v60  ;;  %785 = vst.msk [vmem:[#allocation2 + $0x92] sm:$0x1] %vm382_vm0, %v708_v61  ;;  %v538_v60 = vrot.slane %v5167_v27, %v4906_v8 }
 0x275   :  { %719 = vrot.lane.b32.xlu1 %v5377_v33, %s4740_s0 }
 0x276   :  { %v1346_v57 = vpop.permute.xlu0 %1345  ;;  %v836_v63 = vpop.permute.xlu1 %835 }
 0x277   :  { %1424 = vst.msk [vmem:[#allocation2 + $0x8f] sm:$0x1] %vm382_vm0, %v1346_v57  ;;  %913 = vst.msk [vmem:[#allocation2 + $0x93] sm:$0x1] %vm382_vm0, %v836_v63  ;;  %v542_v57 = vrot.slane %v5181_v31, %v4906_v8 }
 0x279   :  { %721 = vrot.lane.b32.xlu1 %v5403_v51, %s4740_s0 }
 0x27a   :  { %v588_v20 = vpop.permute.xlu0 %587  ;;  %v582_v54 = vpop.permute.xlu1 %581 }
 0x27b   :  { %661 = vst.msk [vmem:[#allocation2 + $0xb1] sm:$0x1] %vm382_vm0, %v588_v20  ;;  %658 = vst.msk [vmem:[#allocation2 + $0x99] sm:$0x1] %vm382_vm0, %v582_v54 }
 0x27d   :  { %847 = vrot.lane.b32.xlu1 %v5377_v33, %s4743_s19 }
 0x27e   :  { %v592_v2 = vpop.permute.xlu0 %591  ;;  %v586_v3 = vpop.permute.xlu1 %585 }
 0x27f   :  { %663 = vst.msk [vmem:[#allocation2 + $0xc1] sm:$0x1] %vm382_vm0, %v592_v2  ;;  %660 = vst.msk [vmem:[#allocation2 + $0xa9] sm:$0x1] %vm382_vm0, %v586_v3 }
 0x281   :  { %849 = vrot.lane.b32.xlu1 %v5403_v51, %s4743_s19 }
 0x282   :  { %v710_v30 = vpop.permute.xlu0 %709  ;;  %v590_v24 = vpop.permute.xlu1 %589 }
 0x283   :  { %786 = vst.msk [vmem:[#allocation2 + $0x9a] sm:$0x1] %vm382_vm0, %v710_v30  ;;  %662 = vst.msk [vmem:[#allocation2 + $0xb9] sm:$0x1] %vm382_vm0, %v590_v24  ;;  %v5673_v30 = vld [vmem:[#allocation2 + $0x20] sm:$0xff] }
 0x285   :  { %975 = vrot.lane.b32.xlu1 %v5377_v33, %s4742_s18 }
 0x286   :  { %v596_v25 = vpop.permute.xlu0 %595  ;;  %v594_v4 = vpop.permute.xlu1 %593 }
 0x287   :  { %665 = vst.msk [vmem:[#allocation2 + $0xd1] sm:$0x1] %vm382_vm0, %v596_v25  ;;  %664 = vst.msk [vmem:[#allocation2 + $0xc9] sm:$0x1] %vm382_vm0, %v594_v4  ;;  %v1484_v25 = vsel %vm1471_vm1, %v5673_v30, -inf }
 0x289   :  { %977 = vrot.lane.b32.xlu1 %v5403_v51, %s4742_s18 }
 0x28a   :  { %v838_v6 = vpop.permute.xlu0 %837  ;;  %v964_v7 = vpop.permute.xlu1 %963 }
 0x28b   :  { %914 = vst.msk [vmem:[#allocation2 + $0x9b] sm:$0x1] %vm382_vm0, %v838_v6  ;;  %1041 = vst.msk [vmem:[#allocation2 + $0x94] sm:$0x1] %vm382_vm0, %v964_v7  ;;  %1476 = vmax.xlane.f32.xlu0 %v1475_v9 }
 0x28d   :  { %1103 = vrot.lane.b32.xlu1 %v5377_v33, %s4745_s21 }
 0x28e   :  { %v966_v10 = vpop.permute.xlu0 %965  ;;  %v1092_v11 = vpop.permute.xlu1 %1091 }
 0x28f   :  { %1042 = vst.msk [vmem:[#allocation2 + $0x9c] sm:$0x1] %vm382_vm0, %v966_v10  ;;  %1169 = vst.msk [vmem:[#allocation2 + $0x95] sm:$0x1] %vm382_vm0, %v1092_v11 }
 0x291   :  { %1231 = vrot.lane.b32.xlu1 %v5377_v33, %s4744_s20 }
 0x292   :  { %v1094_v13 = vpop.permute.xlu0 %1093  ;;  %v1220_v12 = vpop.permute.xlu1 %1219 }
 0x293   :  { %1170 = vst.msk [vmem:[#allocation2 + $0x9d] sm:$0x1] %vm382_vm0, %v1094_v13  ;;  %1297 = vst.msk [vmem:[#allocation2 + $0x96] sm:$0x1] %vm382_vm0, %v1220_v12 }
 0x295   :  { %1233 = vrot.lane.b32.xlu1 %v5403_v51, %s4744_s20 }
 0x296   :  { %v1222_v14 = vpop.permute.xlu0 %1221  ;;  %v1348_v16 = vpop.permute.xlu1 %1347 }
 0x297   :  { %1298 = vst.msk [vmem:[#allocation2 + $0x9e] sm:$0x1] %vm382_vm0, %v1222_v14  ;;  %1425 = vst.msk [vmem:[#allocation2 + $0x97] sm:$0x1] %vm382_vm0, %v1348_v16 }
 0x299   :  { %1359 = vrot.lane.b32.xlu1 %v5377_v33, %s4746_s22 }
 0x29a   :  { %v1350_v17 = vpop.permute.xlu0 %1349  ;;  %v712_v50 = vpop.permute.xlu1 %711 }
 0x29b   :  { %1426 = vst.msk [vmem:[#allocation2 + $0x9f] sm:$0x1] %vm382_vm0, %v1350_v17  ;;  %787 = vst.msk [vmem:[#allocation2 + $0xa2] sm:$0x1] %vm382_vm0, %v712_v50 }
 0x29d   :  { %1361 = vrot.lane.b32.xlu1 %v5403_v51, %s4746_s22 }
 0x29e   :  { %v714_v18 = vpop.permute.xlu0 %713  ;;  %v840_v19 = vpop.permute.xlu1 %839 }
 0x29f   :  { %788 = vst.msk [vmem:[#allocation2 + $0xaa] sm:$0x1] %vm382_vm0, %v714_v18  ;;  %915 = vst.msk [vmem:[#allocation2 + $0xa3] sm:$0x1] %vm382_vm0, %v840_v19  ;;  %v5699_v19 = vld [vmem:[#allocation2 + $0x30] sm:$0xff] }
 0x2a1   :  { %1105 = vrot.lane.b32.xlu0 %v5403_v51, %s4745_s21 }
 0x2a2   :  { %v842_v48 = vpop.permute.xlu0 %841  ;;  %v968_v33 = vpop.permute.xlu1 %967 }
 0x2a3   :  { %916 = vst.msk [vmem:[#allocation2 + $0xab] sm:$0x1] %vm382_vm0, %v842_v48  ;;  %1043 = vst.msk [vmem:[#allocation2 + $0xa4] sm:$0x1] %vm382_vm0, %v968_v33  ;;  %v1490_v48 = vsel %vm1471_vm1, %v5699_v19, -inf }
 0x2a5   :  { %597 = vrot.lane.b32.xlu0 %v526_v62, %s4741_s3 }
 0x2a6   :  { %v970_v34 = vpop.permute.xlu0 %969  ;;  %v1096_v21 = vpop.permute.xlu1 %1095 }
 0x2a7   :  { %1044 = vst.msk [vmem:[#allocation2 + $0xac] sm:$0x1] %vm382_vm0, %v970_v34  ;;  %1171 = vst.msk [vmem:[#allocation2 + $0xa5] sm:$0x1] %vm382_vm0, %v1096_v21  ;;  %v5706_v34 = vld [vmem:[#allocation2 + $0x38] sm:$0xff] }
 0x2a9   :  { %723 = vrot.lane.b32.xlu0 %v5407_v0, %s4740_s0 }
 0x2aa   :  { %v1098_v51 = vpop.permute.xlu0 %1097  ;;  %v1224_v22 = vpop.permute.xlu1 %1223 }
 0x2ab   :  { %1172 = vst.msk [vmem:[#allocation2 + $0xad] sm:$0x1] %vm382_vm0, %v1098_v51  ;;  %1299 = vst.msk [vmem:[#allocation2 + $0xa6] sm:$0x1] %vm382_vm0, %v1224_v22  ;;  %v1493_v51 = vsel %vm1471_vm1, %v5706_v34, -inf }
 0x2ad   :  { %725 = vrot.lane.b32.xlu0 %v526_v62, %s4740_s0 }
 0x2ae   :  { %v1226_v28 = vpop.permute.xlu0 %1225  ;;  %v1352_v15 = vpop.permute.xlu1 %1351 }
 0x2af   :  { %1300 = vst.msk [vmem:[#allocation2 + $0xae] sm:$0x1] %vm382_vm0, %v1226_v28  ;;  %1427 = vst.msk [vmem:[#allocation2 + $0xa7] sm:$0x1] %vm382_vm0, %v1352_v15  ;;  %v5713_v28 = vld [vmem:[#allocation2 + $0x48] sm:$0xff]  ;;  %v5715_v15 = vld [vmem:[#allocation2 + $0x40] sm:$0xff] }
 0x2b1   :  { %851 = vrot.lane.b32.xlu0 %v5407_v0, %s4743_s19 }
 0x2b2   :  { %v1354_v29 = vpop.permute.xlu0 %1353  ;;  %v1230_v1 = vpop.permute.xlu1 %1229 }
 0x2b3   :  { %1428 = vst.msk [vmem:[#allocation2 + $0xaf] sm:$0x1] %vm382_vm0, %v1354_v29  ;;  %1302 = vst.msk [vmem:[#allocation2 + $0xbe] sm:$0x1] %vm382_vm0, %v1230_v1  ;;  %v1499_v29 = vsel %vm1471_vm1, %v5713_v28, -inf  ;;  %v1496_v1 = vsel %vm1471_vm1, %v5715_v15, -inf }
 0x2b5   :  { %853 = vrot.lane.b32.xlu0 %v526_v62, %s4743_s19 }
 0x2b6   :  { %v716_v35 = vpop.permute.xlu0 %715 }
 0x2b7   :  { %789 = vst.msk [vmem:[#allocation2 + $0xb2] sm:$0x1] %vm382_vm0, %v716_v35 }
 0x2b9   :  { %979 = vrot.lane.b32.xlu0 %v5407_v0, %s4742_s18 }
 0x2ba   :  { %v718_v36 = vpop.permute.xlu0 %717 }
 0x2bb   :  { %790 = vst.msk [vmem:[#allocation2 + $0xba] sm:$0x1] %vm382_vm0, %v718_v36  ;;  %v5722_v36 = vld [vmem:[#allocation2 + $0x58] sm:$0xff] }
 0x2bd   :  { %981 = vrot.lane.b32.xlu0 %v526_v62, %s4742_s18 }
 0x2be   :  { %v844_v38 = vpop.permute.xlu0 %843 }
 0x2bf   :  { %917 = vst.msk [vmem:[#allocation2 + $0xb3] sm:$0x1] %vm382_vm0, %v844_v38  ;;  %v5724_v38 = vld [vmem:[#allocation2 + $0x50] sm:$0xff] }
 0x2c1   :  { %1107 = vrot.lane.b32.xlu0 %v5407_v0, %s4745_s21  ;;  %1479 = vmax.xlane.f32.xlu1 %v1478_v39  ;;  %v1505_v39 = vsel %vm1471_vm1, %v5722_v36, -inf }
 0x2c2   :  { %v846_v40 = vpop.permute.xlu0 %845 }
 0x2c3   :  { %918 = vst.msk [vmem:[#allocation2 + $0xbb] sm:$0x1] %vm382_vm0, %v846_v40  ;;  %v1502_v40 = vsel %vm1471_vm1, %v5724_v38, -inf }
 0x2c5   :  { %1109 = vrot.lane.b32.xlu0 %v526_v62, %s4745_s21 }
 0x2c6   :  { %v972_v41 = vpop.permute.xlu0 %971 }
 0x2c7   :  { %1045 = vst.msk [vmem:[#allocation2 + $0xb4] sm:$0x1] %vm382_vm0, %v972_v41 }
 0x2c9   :  { %1237 = vrot.lane.b32.xlu0 %v526_v62, %s4744_s20 }
 0x2ca   :  { %v974_v42 = vpop.permute.xlu0 %973 }
 0x2cb   :  { %1046 = vst.msk [vmem:[#allocation2 + $0xbc] sm:$0x1] %vm382_vm0, %v974_v42  ;;  %v5731_v42 = vld [vmem:[#allocation2 + $0x68] sm:$0xff] }
 0x2cd   :  { %1363 = vrot.lane.b32.xlu0 %v5407_v0, %s4746_s22 }
 0x2ce   :  { %v1100_v49 = vpop.permute.xlu0 %1099 }
 0x2cf   :  { %1173 = vst.msk [vmem:[#allocation2 + $0xb5] sm:$0x1] %vm382_vm0, %v1100_v49  ;;  %v5733_v49 = vld [vmem:[#allocation2 + $0x60] sm:$0xff] }
 0x2d1   :  { %1365 = vrot.lane.b32.xlu0 %v526_v62, %s4746_s22  ;;  %v5704_v62 = vld [vmem:[#allocation2 + $0x28] sm:$0xff] }
 0x2d2   :  { %v1102_v43 = vpop.permute.xlu0 %1101  ;;  %1235 = vrot.lane.b32.xlu1 %v5407_v0, %s4744_s20  ;;  %v1487_v21 = vsel %vm1471_vm1, %v5704_v62, -inf }
 0x2d3   :  { %1174 = vst.msk [vmem:[#allocation2 + $0xbd] sm:$0x1] %vm382_vm0, %v1102_v43  ;;  %v1511_v43 = vsel %vm1471_vm1, %v5731_v42, -inf }
 0x2d6   :  { %v1228_v47 = vpop.permute.xlu0 %1227  ;;  %599 = vrot.lane.b32.xlu1 %v530_v44, %s4741_s3 }
 0x2d7   :  { %1301 = vst.msk [vmem:[#allocation2 + $0xb6] sm:$0x1] %vm382_vm0, %v1228_v47 }
 0x2da   :  { %v1356_v56 = vpop.permute.xlu0 %1355  ;;  %601 = vrot.lane.b32.xlu1 %v534_v55, %s4741_s3 }
 0x2db   :  { %1429 = vst.msk [vmem:[#allocation2 + $0xb7] sm:$0x1] %vm382_vm0, %v1356_v56  ;;  %v5742_v56 = vld [vmem:[#allocation2 + $0x70] sm:$0xff] }
 0x2de   :  { %v1358_v32 = vpop.permute.xlu0 %1357  ;;  %727 = vrot.lane.b32.xlu1 %v530_v44, %s4740_s0 }
 0x2df   :  { %1430 = vst.msk [vmem:[#allocation2 + $0xbf] sm:$0x1] %vm382_vm0, %v1358_v32 }
 0x2e2   :  { %729 = vrot.lane.b32.xlu1 %v534_v55, %s4740_s0 }
 0x2e6   :  { %855 = vrot.lane.b32.xlu1 %v530_v44, %s4743_s19 }
 0x2ea   :  { %857 = vrot.lane.b32.xlu1 %v534_v55, %s4743_s19 }
 0x2ee   :  { %983 = vrot.lane.b32.xlu1 %v530_v44, %s4742_s18 }
 0x2f0   :  { %1482 = vmax.xlane.f32.xlu0 %v1481_v26  ;;  %v1514_v26 = vsel %vm1471_vm1, %v5742_v56, -inf }
 0x2f1   :  { %v5639_v0 = vpop.xlane.xlu1 %1473 }
 0x2f2   :  { %985 = vrot.lane.b32.xlu1 %v534_v55, %s4742_s18 }
 0x2f5   :  { %v720_v46 = vpop.permute.xlu1 %719 }
 0x2f6   :  { %791 = vst.msk [vmem:[#allocation2 + $0xc2] sm:$0x1] %vm382_vm0, %v720_v46  ;;  %1113 = vrot.lane.b32.xlu1 %v534_v55, %s4745_s21 }
 0x2f9   :  { %v722_v58 = vpop.permute.xlu1 %721 }
 0x2fa   :  { %792 = vst.msk [vmem:[#allocation2 + $0xca] sm:$0x1] %vm382_vm0, %v722_v58  ;;  %1239 = vrot.lane.b32.xlu1 %v530_v44, %s4744_s20  ;;  %v5749_v58 = vld [vmem:[#allocation2 + $0x88] sm:$0xff] }
 0x2fd   :  { %v848_v59 = vpop.permute.xlu1 %847 }
 0x2fe   :  { %919 = vst.msk [vmem:[#allocation2 + $0xc3] sm:$0x1] %vm382_vm0, %v848_v59  ;;  %1241 = vrot.lane.b32.xlu1 %v534_v55, %s4744_s20  ;;  %v5751_v59 = vld [vmem:[#allocation2 + $0x80] sm:$0xff] }
 0x301   :  { %v850_v53 = vpop.permute.xlu1 %849 }
 0x302   :  { %920 = vst.msk [vmem:[#allocation2 + $0xcb] sm:$0x1] %vm382_vm0, %v850_v53  ;;  %1367 = vrot.lane.b32.xlu1 %v530_v44, %s4746_s22  ;;  %v1523_v53 = vsel %vm1471_vm1, %v5749_v58, -inf }
 0x305   :  { %v976_v52 = vpop.permute.xlu1 %975 }
 0x306   :  { %1047 = vst.msk [vmem:[#allocation2 + $0xc4] sm:$0x1] %vm382_vm0, %v976_v52  ;;  %1111 = vrot.lane.b32.xlu0 %v530_v44, %s4745_s21  ;;  %1369 = vrot.lane.b32.xlu1 %v534_v55, %s4746_s22  ;;  %v1508_v44 = vsel %vm1471_vm1, %v5733_v49, -inf  ;;  %v5740_v55 = vld [vmem:[#allocation2 + $0x78] sm:$0xff]  ;;  %v1520_v52 = vsel %vm1471_vm1, %v5751_v59, -inf }
 0x307   :  { %v1517_v32 = vsel %vm1471_vm1, %v5740_v55, -inf }
 0x309   :  { %v978_v61 = vpop.permute.xlu1 %977 }
 0x30a   :  { %1048 = vst.msk [vmem:[#allocation2 + $0xcc] sm:$0x1] %vm382_vm0, %v978_v61  ;;  %603 = vrot.lane.b32.xlu1 %v538_v60, %s4741_s3  ;;  %v5758_v61 = vld [vmem:[#allocation2 + $0x98] sm:$0xff] }
 0x30d   :  { %v1104_v63 = vpop.permute.xlu1 %1103 }
 0x30e   :  { %1175 = vst.msk [vmem:[#allocation2 + $0xc5] sm:$0x1] %vm382_vm0, %v1104_v63  ;;  %605 = vrot.lane.b32.xlu1 %v542_v57, %s4741_s3  ;;  %v1529_v63 = vsel %vm1471_vm1, %v5758_v61, -inf }
 0x311   :  { %v1232_v20 = vpop.permute.xlu1 %1231 }
 0x312   :  { %1303 = vst.msk [vmem:[#allocation2 + $0xc6] sm:$0x1] %vm382_vm0, %v1232_v20  ;;  %731 = vrot.lane.b32.xlu1 %v538_v60, %s4740_s0 }
 0x315   :  { %v1234_v54 = vpop.permute.xlu1 %1233 }
 0x316   :  { %1304 = vst.msk [vmem:[#allocation2 + $0xce] sm:$0x1] %vm382_vm0, %v1234_v54  ;;  %733 = vrot.lane.b32.xlu1 %v542_v57, %s4740_s0 }
 0x318   :  { %v5665_v27 = vpop.xlane.xlu0 %1476 }
 0x319   :  { %v1360_v2 = vpop.permute.xlu1 %1359 }
 0x31a   :  { %1431 = vst.msk [vmem:[#allocation2 + $0xc7] sm:$0x1] %vm382_vm0, %v1360_v2  ;;  %859 = vrot.lane.b32.xlu1 %v538_v60, %s4743_s19  ;;  %v5767_v2 = vld [vmem:[#allocation2 + $0xa8] sm:$0xff] }
 0x31c   :  { %v1106_v8 = vpop.permute.xlu0 %1105 }
 0x31d   :  { %1176 = vst.msk [vmem:[#allocation2 + $0xcd] sm:$0x1] %vm382_vm0, %v1106_v8  ;;  %v1362_v31 = vpop.permute.xlu1 %1361  ;;  %v5769_v8 = vld [vmem:[#allocation2 + $0xa0] sm:$0xff] }
 0x31e   :  { %1432 = vst.msk [vmem:[#allocation2 + $0xcf] sm:$0x1] %vm382_vm0, %v1362_v31  ;;  %861 = vrot.lane.b32.xlu1 %v542_v57, %s4743_s19  ;;  %v1535_v31 = vsel %vm1471_vm1, %v5767_v2, -inf }
 0x320   :  { %v598_v3 = vpop.permute.xlu0 %597 }
 0x321   :  { %666 = vst.msk [vmem:[#allocation2 + $0xd9] sm:$0x1] %vm382_vm0, %v598_v3  ;;  %v1532_v3 = vsel %vm1471_vm1, %v5769_v8, -inf }
 0x322   :  { %987 = vrot.lane.b32.xlu1 %v538_v60, %s4742_s18 }
 0x324   :  { %v724_v24 = vpop.permute.xlu0 %723 }
 0x325   :  { %793 = vst.msk [vmem:[#allocation2 + $0xd2] sm:$0x1] %vm382_vm0, %v724_v24  ;;  %1485 = vmax.xlane.f32.xlu0 %v1484_v25  ;;  %v5776_v25 = vld [vmem:[#allocation2 + $0xb8] sm:$0xff] }
 0x326   :  { %989 = vrot.lane.b32.xlu1 %v542_v57, %s4742_s18 }
 0x328   :  { %v726_v4 = vpop.permute.xlu0 %725 }
 0x329   :  { %794 = vst.msk [vmem:[#allocation2 + $0xda] sm:$0x1] %vm382_vm0, %v726_v4  ;;  %v5778_v4 = vld [vmem:[#allocation2 + $0xb0] sm:$0xff] }
 0x32a   :  { %1117 = vrot.lane.b32.xlu1 %v542_v57, %s4745_s21 }
 0x32c   :  { %v852_v6 = vpop.permute.xlu0 %851 }
 0x32d   :  { %921 = vst.msk [vmem:[#allocation2 + $0xd3] sm:$0x1] %vm382_vm0, %v852_v6 }
 0x32e   :  { %1243 = vrot.lane.b32.xlu1 %v538_v60, %s4744_s20 }
 0x330   :  { %v854_v7 = vpop.permute.xlu0 %853 }
 0x331   :  { %922 = vst.msk [vmem:[#allocation2 + $0xdb] sm:$0x1] %vm382_vm0, %v854_v7  ;;  %v1541_v7 = vsel %vm1471_vm1, %v5776_v25, -inf }
 0x332   :  { %1245 = vrot.lane.b32.xlu1 %v542_v57, %s4744_s20 }
 0x334   :  { %v980_v9 = vpop.permute.xlu0 %979 }
 0x335   :  { %1049 = vst.msk [vmem:[#allocation2 + $0xd4] sm:$0x1] %vm382_vm0, %v980_v9  ;;  %v1538_v9 = vsel %vm1471_vm1, %v5778_v4, -inf }
 0x336   :  { %1371 = vrot.lane.b32.xlu1 %v538_v60, %s4746_s22 }
 0x338   :  { %v982_v10 = vpop.permute.xlu0 %981 }
 0x339   :  { %1050 = vst.msk [vmem:[#allocation2 + $0xdc] sm:$0x1] %vm382_vm0, %v982_v10 }
 0x33a   :  { %1373 = vrot.lane.b32.xlu1 %v542_v57, %s4746_s22  ;;  %v5760_v57 = vld [vmem:[#allocation2 + $0x90] sm:$0xff] }
 0x33b   :  { %1115 = vrot.lane.b32.xlu0 %v538_v60, %s4745_s21  ;;  %v1526_v20 = vsel %vm1471_vm1, %v5760_v57, -inf }
 0x33c   :  { %v1108_v11 = vpop.permute.xlu0 %1107 }
 0x33d   :  { %1177 = vst.msk [vmem:[#allocation2 + $0xd5] sm:$0x1] %vm382_vm0, %v1108_v11  ;;  %v5787_v11 = vld [vmem:[#allocation2 + $0xc8] sm:$0xff] }
 0x340   :  { %v1110_v13 = vpop.permute.xlu0 %1109 }
 0x341   :  { %1178 = vst.msk [vmem:[#allocation2 + $0xdd] sm:$0x1] %vm382_vm0, %v1110_v13  ;;  %v5789_v13 = vld [vmem:[#allocation2 + $0xc0] sm:$0xff] }
 0x344   :  { %v1238_v12 = vpop.permute.xlu0 %1237 }
 0x345   :  { %1306 = vst.msk [vmem:[#allocation2 + $0xde] sm:$0x1] %vm382_vm0, %v1238_v12 }
 0x348   :  { %v1364_v14 = vpop.permute.xlu0 %1363 }
 0x349   :  { %1433 = vst.msk [vmem:[#allocation2 + $0xd7] sm:$0x1] %vm382_vm0, %v1364_v14  ;;  %v1547_v14 = vsel %vm1471_vm1, %v5787_v11, -inf }
 0x34c   :  { %v1366_v16 = vpop.permute.xlu0 %1365 }
 0x34d   :  { %1434 = vst.msk [vmem:[#allocation2 + $0xdf] sm:$0x1] %vm382_vm0, %v1366_v16  ;;  %v1544_v16 = vsel %vm1471_vm1, %v5789_v13, -inf }
 0x34e   :  { %v5696_v17 = vpop.xlane.xlu1 %1479 }
 0x352   :  { %v1236_v50 = vpop.permute.xlu1 %1235 }
 0x353   :  { %1305 = vst.msk [vmem:[#allocation2 + $0xd6] sm:$0x1] %vm382_vm0, %v1236_v50 }
 0x356   :  { %v600_v18 = vpop.permute.xlu1 %599 }
 0x357   :  { %667 = vst.msk [vmem:[#allocation2 + $0xe1] sm:$0x1] %vm382_vm0, %v600_v18  ;;  %v5797_v18 = vld [vmem:[#allocation2 + $0xd8] sm:$0xff] }
 0x35a   :  { %1491 = vmax.xlane.f32.xlu0 %v1490_v48  ;;  %v602_v33 = vpop.permute.xlu1 %601  ;;  %v5799_v48 = vld [vmem:[#allocation2 + $0xd0] sm:$0xff] }
 0x35b   :  { %668 = vst.msk [vmem:[#allocation2 + $0xe9] sm:$0x1] %vm382_vm0, %v602_v33  ;;  %v1553_v33 = vsel %vm1471_vm1, %v5797_v18, -inf }
 0x35e   :  { %1488 = vmax.xlane.f32.xlu1 %v1487_v21  ;;  %v728_v22 = vpop.permute.xlu1 %727  ;;  %1494 = vmax.xlane.f32.xlu0 %v1493_v51  ;;  %v1550_v21 = vsel %vm1471_vm1, %v5799_v48, -inf }
 0x35f   :  { %795 = vst.msk [vmem:[#allocation2 + $0xe2] sm:$0x1] %vm382_vm0, %v728_v22 }
 0x362   :  { %1500 = vmax.xlane.f32.xlu1 %v1499_v29  ;;  %v730_v35 = vpop.permute.xlu1 %729  ;;  %1497 = vmax.xlane.f32.xlu0 %v1496_v1 }
 0x363   :  { %796 = vst.msk [vmem:[#allocation2 + $0xea] sm:$0x1] %vm382_vm0, %v730_v35 }
 0x366   :  { %1506 = vmax.xlane.f32.xlu1 %v1505_v39  ;;  %v856_v41 = vpop.permute.xlu1 %855  ;;  %1503 = vmax.xlane.f32.xlu0 %v1502_v40 }
 0x367   :  { %923 = vst.msk [vmem:[#allocation2 + $0xe3] sm:$0x1] %vm382_vm0, %v856_v41 }
 0x36a   :  { %1512 = vmax.xlane.f32.xlu1 %v1511_v43  ;;  %v858_v47 = vpop.permute.xlu1 %857  ;;  %1509 = vmax.xlane.f32.xlu0 %v1508_v44 }
 0x36b   :  { %924 = vst.msk [vmem:[#allocation2 + $0xeb] sm:$0x1] %vm382_vm0, %v858_v47 }
 0x36e   :  { %1518 = vmax.xlane.f32.xlu1 %v1517_v32  ;;  %v984_v46 = vpop.permute.xlu1 %983  ;;  %1515 = vmax.xlane.f32.xlu0 %v1514_v26 }
 0x36f   :  { %1051 = vst.msk [vmem:[#allocation2 + $0xe4] sm:$0x1] %vm382_vm0, %v984_v46 }
 0x372   :  { %1524 = vmax.xlane.f32.xlu1 %v1523_v53  ;;  %v986_v60 = vpop.permute.xlu1 %985  ;;  %1521 = vmax.xlane.f32.xlu0 %v1520_v52  ;;  %v1568_v53 = vsub.f32 %v5508_v45, %v5639_v0 }
 0x373   :  { %1052 = vst.msk [vmem:[#allocation2 + $0xec] sm:$0x1] %vm382_vm0, %v986_v60  ;;  %v1569_v60 = vsub.f32 %v5548_v5, %v5665_v27 }
 0x376   :  { %1530 = vmax.xlane.f32.xlu1 %v1529_v63  ;;  %v1114_v54 = vpop.permute.xlu1 %1113  ;;  %1527 = vmax.xlane.f32.xlu0 %v1526_v20  ;;  %v1600_v63 = vmul.f32 1.442695, %v1568_v53  ;;  %v1570_v20 = vsub.f32 %v5602_v37, %v5696_v17 }
 0x377   :  { %1180 = vst.msk [vmem:[#allocation2 + $0xed] sm:$0x1] %vm382_vm0, %v1114_v54 }
 0x378   :  { %4587 = vpow2.f32 %v1600_v63  ;;  %v1604_v45 = vmul.f32 1.442695, %v1570_v20 }
 0x37a   :  { %1536 = vmax.xlane.f32.xlu1 %v1535_v31  ;;  %v1240_v24 = vpop.permute.xlu1 %1239  ;;  %1533 = vmax.xlane.f32.xlu0 %v1532_v3  ;;  %v1602_v3 = vmul.f32 1.442695, %v1569_v60 }
 0x37b   :  { %1307 = vst.msk [vmem:[#allocation2 + $0xe6] sm:$0x1] %vm382_vm0, %v1240_v24 }
 0x37c   :  { %4589 = vpow2.f32 %v1602_v3 }
 0x37d   :  { %v5781_v6 = vpop.xlane.xlu0 %1482  ;;  %4591 = vpow2.f32 %v1604_v45 }
 0x37e   :  { %1542 = vmax.xlane.f32.xlu1 %v1541_v7  ;;  %v1242_v10 = vpop.permute.xlu1 %1241  ;;  %1539 = vmax.xlane.f32.xlu0 %v1538_v9  ;;  %v1571_v24 = vsub.f32 %v5634_v23, %v5781_v6 }
 0x37f   :  { %1308 = vst.msk [vmem:[#allocation2 + $0xee] sm:$0x1] %vm382_vm0, %v1242_v10 }
 0x380   :  { %v1606_v5 = vmul.f32 1.442695, %v1571_v24 }
 0x381   :  { %v1112_v12 = vpop.permute.xlu0 %1111 }
 0x382   :  { %1179 = vst.msk [vmem:[#allocation2 + $0xe5] sm:$0x1] %vm382_vm0, %v1112_v12  ;;  %1548 = vmax.xlane.f32.xlu1 %v1547_v14  ;;  %v1368_v50 = vpop.permute.xlu1 %1367  ;;  %1545 = vmax.xlane.f32.xlu0 %v1544_v16  ;;  %4593 = vpow2.f32 %v1606_v5  ;;  %v5842_v17 = vpop.eup %4587 }
 0x383   :  { %1435 = vst.msk [vmem:[#allocation2 + $0xe7] sm:$0x1] %vm382_vm0, %v1368_v50  ;;  %v1664_v14 = vsel %vm1471_vm1, %v5842_v17, 0.0 }
 0x386   :  { %1554 = vmax.xlane.f32.xlu1 %v1553_v33  ;;  %v1370_v51 = vpop.permute.xlu1 %1369  ;;  %1551 = vmax.xlane.f32.xlu0 %v1550_v21  ;;  %v5846_v10 = vpop.eup %4589 }
 0x387   :  { %1436 = vst.msk [vmem:[#allocation2 + $0xef] sm:$0x1] %vm382_vm0, %v1370_v51  ;;  %v5852_v16 = vpop.eup %4591  ;;  %v1667_v33 = vsel %vm1471_vm1, %v5846_v10, 0.0 }
 0x388   :  { %v1670_v21 = vsel %vm1471_vm1, %v5852_v16, 0.0 }
 0x38a   :  { %v604_v22 = vpop.permute.xlu1 %603  ;;  %v5807_v29 = vld [vmem:[#allocation2 + $0xe0] sm:$0xff] }
 0x38b   :  { %669 = vst.msk [vmem:[#allocation2 + $0xf1] sm:$0x1] %vm382_vm0, %v604_v22  ;;  %v1556_v1 = vsel %vm1471_vm1, %v5807_v29, -inf }
 0x38c   :  { %1557 = vmax.xlane.f32.xlu0 %v1556_v1  ;;  %v5854_v50 = vpop.eup %4593 }
 0x38d   :  { %v1673_v22 = vsel %vm1471_vm1, %v5854_v50, 0.0 }
 0x38e   :  { %v606_v35 = vpop.permute.xlu1 %605  ;;  %v5812_v39 = vld [vmem:[#allocation2 + $0xe8] sm:$0xff] }
 0x38f   :  { %670 = vst.msk [vmem:[#allocation2 + $0xf9] sm:$0x1] %vm382_vm0, %v606_v35  ;;  %v1559_v40 = vsel %vm1471_vm1, %v5812_v39, -inf  ;;  %v4747_v35 = vmov 0.0  }
 0x390   :  { %1560 = vmax.xlane.f32.xlu1 %v1559_v40  ;;  %4382 = vmatprep.subr.mxu1 %v4747_v35  ;;  %v1824_v40 = vld [vmem:[%s6302_s1] sm:$0xff] }
 0x391   :  { %4442 = vmatprep.subr.mxu0 %v4747_v35  ;;  %4383 = vmatpush3.msra.mxu1 %v1824_v40 }
 0x392   :  { %v732_v41 = vpop.permute.xlu1 %731  ;;  %4384 = vmatprep.mubr.msk.f32.mxu1 %vm4748_vm2, %v4747_v35  ;;  %4387 = vmatprep.subr.mxu1 %v4747_v35 }
 0x393   :  { %797 = vst.msk [vmem:[#allocation2 + $0xf2] sm:$0x1] %vm382_vm0, %v732_v41  ;;  %4444 = vmatprep.mubr.msk.f32.mxu0 %vm4748_vm2, %v4747_v35 }
 0x396   :  { %v734_v43 = vpop.permute.xlu1 %733 }
 0x397   :  { %798 = vst.msk [vmem:[#allocation2 + $0xfa] sm:$0x1] %vm382_vm0, %v734_v43 }
 0x39a   :  { %v860_v44 = vpop.permute.xlu1 %859 }
 0x39b   :  { %925 = vst.msk [vmem:[#allocation2 + $0xf3] sm:$0x1] %vm382_vm0, %v860_v44 }
 0x39e   :  { %v862_v47 = vpop.permute.xlu1 %861 }
 0x39f   :  { %926 = vst.msk [vmem:[#allocation2 + $0xfb] sm:$0x1] %vm382_vm0, %v862_v47 }
 0x3a2   :  { %v988_v32 = vpop.permute.xlu1 %987 }
 0x3a3   :  { %1053 = vst.msk [vmem:[#allocation2 + $0xf4] sm:$0x1] %vm382_vm0, %v988_v32 }
 0x3a6   :  { %v990_v26 = vpop.permute.xlu1 %989 }
 0x3a7   :  { %1054 = vst.msk [vmem:[#allocation2 + $0xfc] sm:$0x1] %vm382_vm0, %v990_v26 }
 0x3aa   :  { %v1118_v46 = vpop.permute.xlu1 %1117 }
 0x3ab   :  { %1182 = vst.msk [vmem:[#allocation2 + $0xfd] sm:$0x1] %vm382_vm0, %v1118_v46 }
 0x3ae   :  { %v1244_v52 = vpop.permute.xlu1 %1243 }
 0x3af   :  { %1309 = vst.msk [vmem:[#allocation2 + $0xf6] sm:$0x1] %vm382_vm0, %v1244_v52 }
 0x3b2   :  { %v1486_v54 = vpop.xlane.xlu0 %1485  ;;  %v1246_v31 = vpop.permute.xlu1 %1245 }
 0x3b3   :  { %1310 = vst.msk [vmem:[#allocation2 + $0xfe] sm:$0x1] %vm382_vm0, %v1246_v31  ;;  %v1572_v0 = vsub.f32 %v5673_v30, %v1486_v54 }
 0x3b5   :  { %v1608_v37 = vmul.f32 1.442695, %v1572_v0 }
 0x3b6   :  { %v1116_v7 = vpop.permute.xlu0 %1115  ;;  %v1372_v9 = vpop.permute.xlu1 %1371 }
 0x3b7   :  { %1181 = vst.msk [vmem:[#allocation2 + $0xf5] sm:$0x1] %vm382_vm0, %v1116_v7  ;;  %1437 = vst.msk [vmem:[#allocation2 + $0xf7] sm:$0x1] %vm382_vm0, %v1372_v9  ;;  %4595 = vpow2.f32 %v1608_v37 }
 0x3ba   :  { %v1374_v27 = vpop.permute.xlu1 %1373 }
 0x3bb   :  { %1438 = vst.msk [vmem:[#allocation2 + $0xff] sm:$0x1] %vm382_vm0, %v1374_v27 }
 0x3be   :  { %v5838_v23 = vld [vmem:[#allocation2 + $0xf0] sm:$0xff] }
 0x3bf   :  { %v1562_v30 = vsel %vm1471_vm1, %v5838_v23, -inf }
 0x3c0   :  { %1563 = vmax.xlane.f32.xlu0 %v1562_v30 }
 0x3c1   :  { %v5860_v51 = vpop.eup %4595 }
 0x3c2   :  { %v5844_v6 = vld [vmem:[#allocation2 + $0xf8] sm:$0xff]  ;;  %v1676_v1 = vsel %vm1471_vm1, %v5860_v51, 0.0 }
 0x3c3   :  { %v1565_v12 = vsel %vm1471_vm1, %v5844_v6, -inf }
 0x3c4   :  { %1566 = vmax.xlane.f32.xlu1 %v1565_v12  ;;  %1665 = vadd.xlane.f32.xlu0 %v1664_v14 }
 0x3c8   :  { %1668 = vadd.xlane.f32.xlu1 %v1667_v33  ;;  %1671 = vadd.xlane.f32.xlu0 %v1670_v21 }
 0x3cc   :  { %1674 = vadd.xlane.f32.xlu1 %v1673_v22  ;;  %1677 = vadd.xlane.f32.xlu0 %v1676_v1 }
 0x3e7   :  { %v1492_v41 = vpop.xlane.xlu0 %1491 }
 0x3e8   :  { %v1574_v43 = vsub.f32 %v5699_v19, %v1492_v41 }
 0x3ea   :  { %v1612_v44 = vmul.f32 1.442695, %v1574_v43 }
 0x3eb   :  { %v1489_v47 = vpop.xlane.xlu1 %1488  ;;  %v1495_v32 = vpop.xlane.xlu0 %1494 }
 0x3ec   :  { %4597 = vpow2.f32 %v1612_v44  ;;  %v1573_v26 = vsub.f32 %v5704_v62, %v1489_v47  ;;  %v1575_v46 = vsub.f32 %v5706_v34, %v1495_v32 }
 0x3ee   :  { %v1610_v53 = vmul.f32 1.442695, %v1573_v26  ;;  %v1614_v52 = vmul.f32 1.442695, %v1575_v46 }
 0x3ef   :  { %v1501_v60 = vpop.xlane.xlu1 %1500  ;;  %v1498_v63 = vpop.xlane.xlu0 %1497 }
 0x3f0   :  { %4599 = vpow2.f32 %v1610_v53  ;;  %v1577_v20 = vsub.f32 %v5713_v28, %v1501_v60  ;;  %v1576_v54 = vsub.f32 %v5715_v15, %v1498_v63 }
 0x3f1   :  { %4601 = vpow2.f32 %v1614_v52 }
 0x3f2   :  { %v1618_v31 = vmul.f32 1.442695, %v1577_v20  ;;  %v1616_v19 = vmul.f32 1.442695, %v1576_v54 }
 0x3f3   :  { %v1507_v3 = vpop.xlane.xlu1 %1506  ;;  %v1504_v24 = vpop.xlane.xlu0 %1503 }
 0x3f4   :  { %v1579_v45 = vsub.f32 %v5722_v36, %v1507_v3  ;;  %v1578_v62 = vsub.f32 %v5724_v38, %v1504_v24  ;;  %4603 = vpow2.f32 %v1616_v19 }
 0x3f5   :  { %4605 = vpow2.f32 %v1618_v31 }
 0x3f6   :  { %v5883_v34 = vpop.eup %4597  ;;  %v1622_v0 = vmul.f32 1.442695, %v1579_v45  ;;  %v1620_v7 = vmul.f32 1.442695, %v1578_v62 }
 0x3f7   :  { %v1513_v9 = vpop.xlane.xlu1 %1512  ;;  %v1510_v5 = vpop.xlane.xlu0 %1509  ;;  %v1682_v28 = vsel %vm1471_vm1, %v5883_v34, 0.0 }
 0x3f8   :  { %v1581_v15 = vsub.f32 %v5731_v42, %v1513_v9  ;;  %v1580_v37 = vsub.f32 %v5733_v49, %v1510_v5  ;;  %1683 = vadd.xlane.f32.xlu0 %v1682_v28  ;;  %4607 = vpow2.f32 %v1620_v7 }
 0x3f9   :  { %4609 = vpow2.f32 %v1622_v0 }
 0x3fa   :  { %v5889_v36 = vpop.eup %4599  ;;  %v1626_v38 = vmul.f32 1.442695, %v1581_v15  ;;  %v1624_v27 = vmul.f32 1.442695, %v1580_v37 }
 0x3fb   :  { %v1519_v30 = vpop.xlane.xlu1 %1518  ;;  %v1516_v12 = vpop.xlane.xlu0 %1515  ;;  %v1679_v14 = vsel %vm1471_vm1, %v5889_v36, 0.0 }
 0x3fc   :  { %v5893_v33 = vpop.eup %4601  ;;  %v1583_v21 = vsub.f32 %v5740_v55, %v1519_v30  ;;  %v1582_v42 = vsub.f32 %v5742_v56, %v1516_v12  ;;  %1680 = vadd.xlane.f32.xlu1 %v1679_v14  ;;  %4611 = vpow2.f32 %v1624_v27 }
 0x3fd   :  { %4613 = vpow2.f32 %v1626_v38  ;;  %v1685_v43 = vsel %vm1471_vm1, %v5893_v33, 0.0 }
 0x3fe   :  { %v1630_v49 = vmul.f32 1.442695, %v1583_v21  ;;  %v1628_v22 = vmul.f32 1.442695, %v1582_v42  ;;  %v5897_v1 = vpop.eup %4603 }
 0x3ff   :  { %v1525_v40 = vpop.xlane.xlu1 %1524  ;;  %v1522_v41 = vpop.xlane.xlu0 %1521  ;;  %v1688_v56 = vsel %vm1471_vm1, %v5897_v1, 0.0 }
 0x400   :  { %v5901_v44 = vpop.eup %4605  ;;  %v1585_v47 = vsub.f32 %v5749_v58, %v1525_v40  ;;  %v1584_v55 = vsub.f32 %v5751_v59, %v1522_v41  ;;  %1686 = vadd.xlane.f32.xlu1 %v1685_v43  ;;  %4615 = vpow2.f32 %v1628_v22  ;;  %1689 = vadd.xlane.f32.xlu0 %v1688_v56 }
 0x401   :  { %4617 = vpow2.f32 %v1630_v49  ;;  %v1691_v60 = vsel %vm1471_vm1, %v5901_v44, 0.0 }
 0x402   :  { %v1634_v32 = vmul.f32 1.442695, %v1585_v47  ;;  %v1632_v26 = vmul.f32 1.442695, %v1584_v55  ;;  %v5907_v46 = vpop.eup %4607 }
 0x403   :  { %v1531_v53 = vpop.xlane.xlu1 %1530  ;;  %v1528_v52 = vpop.xlane.xlu0 %1527  ;;  %v1694_v20 = vsel %vm1471_vm1, %v5907_v46, 0.0 }
 0x404   :  { %v5911_v63 = vpop.eup %4609  ;;  %v1587_v58 = vsub.f32 %v5758_v61, %v1531_v53  ;;  %v1586_v59 = vsub.f32 %v5760_v57, %v1528_v52  ;;  %1692 = vadd.xlane.f32.xlu1 %v1691_v60  ;;  %4619 = vpow2.f32 %v1632_v26  ;;  %1695 = vadd.xlane.f32.xlu0 %v1694_v20 }
 0x405   :  { %4621 = vpow2.f32 %v1634_v32  ;;  %v1697_v45 = vsel %vm1471_vm1, %v5911_v63, 0.0 }
 0x406   :  { %v1638_v54 = vmul.f32 1.442695, %v1587_v58  ;;  %v1636_v31 = vmul.f32 1.442695, %v1586_v59  ;;  %v5917_v19 = vpop.eup %4611 }
 0x407   :  { %v1537_v3 = vpop.xlane.xlu1 %1536  ;;  %v1534_v24 = vpop.xlane.xlu0 %1533  ;;  %v1700_v0 = vsel %vm1471_vm1, %v5917_v19, 0.0 }
 0x408   :  { %v5921_v62 = vpop.eup %4613  ;;  %v1589_v61 = vsub.f32 %v5767_v2, %v1537_v3  ;;  %v1588_v57 = vsub.f32 %v5769_v8, %v1534_v24  ;;  %1698 = vadd.xlane.f32.xlu1 %v1697_v45  ;;  %4623 = vpow2.f32 %v1636_v31  ;;  %1701 = vadd.xlane.f32.xlu0 %v1700_v0 }
 0x409   :  { %4625 = vpow2.f32 %v1638_v54  ;;  %v1703_v37 = vsel %vm1471_vm1, %v5921_v62, 0.0 }
 0x40a   :  { %v1642_v7 = vmul.f32 1.442695, %v1589_v61  ;;  %v1640_v9 = vmul.f32 1.442695, %v1588_v57  ;;  %v5927_v5 = vpop.eup %4615 }
 0x40b   :  { %v1543_v28 = vpop.xlane.xlu1 %1542  ;;  %v1540_v15 = vpop.xlane.xlu0 %1539  ;;  %v1706_v27 = vsel %vm1471_vm1, %v5927_v5, 0.0 }
 0x40c   :  { %v5931_v38 = vpop.eup %4617  ;;  %v1591_v2 = vsub.f32 %v5776_v25, %v1543_v28  ;;  %v1590_v8 = vsub.f32 %v5778_v4, %v1540_v15  ;;  %1704 = vadd.xlane.f32.xlu1 %v1703_v37  ;;  %4627 = vpow2.f32 %v1640_v9  ;;  %1707 = vadd.xlane.f32.xlu0 %v1706_v27 }
 0x40d   :  { %4629 = vpow2.f32 %v1642_v7  ;;  %v1709_v49 = vsel %vm1471_vm1, %v5931_v38, 0.0 }
 0x40e   :  { %v1646_v30 = vmul.f32 1.442695, %v1591_v2  ;;  %v1644_v12 = vmul.f32 1.442695, %v1590_v8  ;;  %v5937_v14 = vpop.eup %4619 }
 0x40f   :  { %v1549_v21 = vpop.xlane.xlu1 %1548  ;;  %v1546_v42 = vpop.xlane.xlu0 %1545  ;;  %v1712_v40 = vsel %vm1471_vm1, %v5937_v14, 0.0 }
 0x410   :  { %v5941_v22 = vpop.eup %4621  ;;  %v1593_v25 = vsub.f32 %v5787_v11, %v1549_v21  ;;  %v1592_v4 = vsub.f32 %v5789_v13, %v1546_v42  ;;  %1710 = vadd.xlane.f32.xlu1 %v1709_v49  ;;  %4631 = vpow2.f32 %v1644_v12  ;;  %1713 = vadd.xlane.f32.xlu0 %v1712_v40 }
 0x411   :  { %4633 = vpow2.f32 %v1646_v30  ;;  %v1715_v32 = vsel %vm1471_vm1, %v5941_v22, 0.0 }
 0x412   :  { %v1650_v41 = vmul.f32 1.442695, %v1593_v25  ;;  %v1648_v43 = vmul.f32 1.442695, %v1592_v4  ;;  %v5947_v47 = vpop.eup %4623 }
 0x413   :  { %v1555_v55 = vpop.xlane.xlu1 %1554  ;;  %v1552_v56 = vpop.xlane.xlu0 %1551  ;;  %v1718_v53 = vsel %vm1471_vm1, %v5947_v47, 0.0 }
 0x414   :  { %v5951_v26 = vpop.eup %4625  ;;  %v1595_v11 = vsub.f32 %v5797_v18, %v1555_v55  ;;  %v1594_v13 = vsub.f32 %v5799_v48, %v1552_v56  ;;  %1716 = vadd.xlane.f32.xlu1 %v1715_v32  ;;  %4635 = vpow2.f32 %v1648_v43  ;;  %1719 = vadd.xlane.f32.xlu0 %v1718_v53 }
 0x415   :  { %4637 = vpow2.f32 %v1650_v41  ;;  %v1721_v59 = vsel %vm1471_vm1, %v5951_v26, 0.0 }
 0x416   :  { %v1654_v52 = vmul.f32 1.442695, %v1595_v11  ;;  %v1652_v60 = vmul.f32 1.442695, %v1594_v13  ;;  %v5957_v58 = vpop.eup %4627 }
 0x417   :  { %v5961_v20 = vpop.eup %4629  ;;  %v1724_v18 = vsel %vm1471_vm1, %v5957_v58, 0.0 }
 0x418   :  { %1722 = vadd.xlane.f32.xlu1 %v1721_v59  ;;  %4639 = vpow2.f32 %v1652_v60  ;;  %1725 = vadd.xlane.f32.xlu0 %v1724_v18  ;;  %v1727_v3 = vsel %vm1471_vm1, %v5961_v20, 0.0 }
 0x419   :  { %v1558_v48 = vpop.xlane.xlu0 %1557  ;;  %4641 = vpow2.f32 %v1654_v52 }
 0x41a   :  { %v1596_v54 = vsub.f32 %v5807_v29, %v1558_v48  ;;  %v5966_v31 = vpop.eup %4631 }
 0x41b   :  { %v5970_v24 = vpop.eup %4633  ;;  %v1730_v61 = vsel %vm1471_vm1, %v5966_v31, 0.0 }
 0x41c   :  { %v1656_v45 = vmul.f32 1.442695, %v1596_v54  ;;  %1728 = vadd.xlane.f32.xlu1 %v1727_v3  ;;  %1731 = vadd.xlane.f32.xlu0 %v1730_v61  ;;  %v1733_v29 = vsel %vm1471_vm1, %v5970_v24, 0.0 }
 0x41d   :  { %v1561_v57 = vpop.xlane.xlu1 %1560 }
 0x41e   :  { %4643 = vpow2.f32 %v1656_v45  ;;  %v1597_v0 = vsub.f32 %v5812_v39, %v1561_v57  ;;  %v5975_v7 = vpop.eup %4635  ;;  %v1836_v39 = vld [vmem:[%s6302_s1 + $0x60] sm:$0xff] }
 0x41f   :  { %v5979_v9 = vpop.eup %4637  ;;  %v1736_v15 = vsel %vm1471_vm1, %v5975_v7, 0.0  ;;  %4443 = vmatpush3.msra.mxu0 %v1836_v39 }
 0x420   :  { %v1658_v28 = vmul.f32 1.442695, %v1597_v0  ;;  %1734 = vadd.xlane.f32.xlu1 %v1733_v29  ;;  %1737 = vadd.xlane.f32.xlu0 %v1736_v15  ;;  %v1739_v2 = vsel %vm1471_vm1, %v5979_v9, 0.0 }
 0x421   :  { %4452 = vmatprep.subr.mxu0 %v4747_v35 }
 0x422   :  { %4645 = vpow2.f32 %v1658_v28  ;;  %v5983_v37 = vpop.eup %4639 }
 0x423   :  { %v5990_v8 = vpop.eup %4641  ;;  %v1742_v27 = vsel %vm1471_vm1, %v5983_v37, 0.0 }
 0x424   :  { %1740 = vadd.xlane.f32.xlu1 %v1739_v2  ;;  %1743 = vadd.xlane.f32.xlu0 %v1742_v27  ;;  %v1745_v30 = vsel %vm1471_vm1, %v5990_v8, 0.0 }
 0x428   :  { %v5997_v12 = vpop.eup %4643  ;;  %1746 = vadd.xlane.f32.xlu1 %v1745_v30 }
 0x429   :  { %v1748_v21 = vsel %vm1471_vm1, %v5997_v12, 0.0 }
 0x42a   :  { %1749 = vadd.xlane.f32.xlu0 %v1748_v21 }
 0x42c   :  { %v6001_v42 = vpop.eup %4645 }
 0x42d   :  { %v1751_v49 = vsel %vm1471_vm1, %v6001_v42, 0.0 }
 0x42e   :  { %1752 = vadd.xlane.f32.xlu1 %v1751_v49 }
 0x44d   :  { %v1564_v25 = vpop.xlane.xlu0 %1563 }
 0x44e   :  { %v1598_v4 = vsub.f32 %v5838_v23, %v1564_v25 }
 0x450   :  { %v1660_v40 = vmul.f32 1.442695, %v1598_v4  ;;  %v1830_v4 = vld [vmem:[%s6302_s1 + $0x30] sm:$0xff] }
 0x451   :  { %v1567_v41 = vpop.xlane.xlu1 %1566  ;;  %v1666_v43 = vpop.xlane.xlu0 %1665 }
 0x452   :  { %4647 = vpow2.f32 %v1660_v40  ;;  %v1599_v55 = vsub.f32 %v5844_v6, %v1567_v41  ;;  %v1825_v6 = vld [vmem:[%s6302_s1 + $0x8] sm:$0xff] }
 0x453   :  { %4649 = vrcp.f32 %v1666_v43 }
 0x454   :  { %v1662_v56 = vmul.f32 1.442695, %v1599_v55 }
 0x455   :  { %v1669_v32 = vpop.xlane.xlu1 %1668  ;;  %v1672_v11 = vpop.xlane.xlu0 %1671 }
 0x456   :  { %4651 = vpow2.f32 %v1662_v56 }
 0x457   :  { %4653 = vrcp.f32 %v1669_v32 }
 0x458   :  { %4655 = vrcp.f32 %v1672_v11 }
 0x459   :  { %v1675_v13 = vpop.xlane.xlu1 %1674  ;;  %v1678_v60 = vpop.xlane.xlu0 %1677 }
 0x45a   :  { %4657 = vrcp.f32 %v1675_v13  ;;  %v1832_v13 = vld [vmem:[%s6302_s1 + $0x40] sm:$0xff] }
 0x45b   :  { %4659 = vrcp.f32 %v1678_v60 }
 0x45c   :  { %v6007_v53 = vpop.eup %4647 }
 0x45d   :  { %v4650_v52 = vpop.eup %4649  ;;  %v1754_v23 = vsel %vm1471_vm1, %v6007_v53, 0.0 }
 0x45e   :  { %1755 = vadd.xlane.f32.xlu0 %v1754_v23  ;;  %v1761_v59 = vmul.f32 %v4650_v52, %v5842_v17  ;;  %v1826_v17 = vld [vmem:[%s6302_s1 + $0x10] sm:$0xff] }
 0x460   :  { %v6015_v18 = vpop.eup %4651  ;;  %4385 = vmatmul.mubr.msk.f32.vlgmr.msra.gmra.mrb[0].mxu1 %vm1471_vm1, %v1761_v59 }
 0x461   :  { %v4654_v48 = vpop.eup %4653  ;;  %v1757_v54 = vsel %vm1471_vm1, %v6015_v18, 0.0  ;;  %4388 = vmatpush3.msra.mxu1 %v1825_v6  ;;  %4389 = vmatprep.mubr.msk.f32.mxu1 %vm4748_vm2, %v4747_v35  ;;  %v1833_v6 = vld [vmem:[%s6302_s1 + $0x48] sm:$0xff] }
 0x462   :  { %v1763_v3 = vmul.f32 %v4654_v48, %v5846_v10  ;;  %1758 = vadd.xlane.f32.xlu1 %v1757_v54  ;;  %4392 = vmatprep.subr.mxu1 %v4747_v35  ;;  %v4656_v45 = vpop.eup %4655  ;;  %v1827_v10 = vld [vmem:[%s6302_s1 + $0x18] sm:$0xff] }
 0x463   :  { %v1765_v61 = vmul.f32 %v4656_v45, %v5852_v16  ;;  %v1828_v16 = vld [vmem:[%s6302_s1 + $0x20] sm:$0xff] }
 0x464   :  { %4390 = vmatmul.mubr.msk.f32.vlgmr.msra.gmra.mrb[2].mxu1 %vm1471_vm1, %v1763_v3  ;;  %v4658_v57 = vpop.eup %4657 }
 0x465   :  { %4393 = vmatpush3.msra.mxu1 %v1826_v17  ;;  %4394 = vmatprep.mubr.msk.f32.mxu1 %vm4748_vm2, %v4747_v35  ;;  %v1767_v0 = vmul.f32 %v4658_v57, %v5854_v50  ;;  %v4660_v29 = vpop.eup %4659  ;;  %v1829_v50 = vld [vmem:[%s6302_s1 + $0x28] sm:$0xff]  ;;  %v1838_v17 = vld [vmem:[%s6302_s1 + $0x70] sm:$0xff] }
 0x466   :  { %4397 = vmatprep.subr.mxu1 %v4747_v35  ;;  %v1769_v28 = vmul.f32 %v4660_v29, %v5860_v51  ;;  %v1835_v29 = vld [vmem:[%s6302_s1 + $0x58] sm:$0xff] }
 0x468   :  { %4395 = vmatmul.mubr.msk.f32.vlgmr.msra.gmra.mrb[4].mxu1 %vm1471_vm1, %v1765_v61 }
 0x469   :  { %4398 = vmatpush3.msra.mxu1 %v1827_v10  ;;  %4399 = vmatprep.mubr.msk.f32.mxu1 %vm4748_vm2, %v4747_v35 }
 0x46a   :  { %4402 = vmatprep.subr.mxu1 %v4747_v35 }
 0x46c   :  { %4400 = vmatmul.mubr.msk.f32.vlgmr.msra.gmra.mrb[6].mxu1 %vm1471_vm1, %v1767_v0 }
 0x46d   :  { %4403 = vmatpush3.msra.mxu1 %v1828_v16  ;;  %4404 = vmatprep.mubr.msk.f32.mxu1 %vm4748_vm2, %v4747_v35 }
 0x46e   :  { %4407 = vmatprep.subr.mxu1 %v4747_v35 }
 0x470   :  { %4405 = vmatmul.mubr.msk.f32.vlgmr.msra.gmra.mrb[8].mxu1 %vm1471_vm1, %v1769_v28 }
 0x471   :  { %4408 = vmatpush3.msra.mxu1 %v1829_v50  ;;  %4409 = vmatprep.mubr.msk.f32.mxu1 %vm4748_vm2, %v4747_v35 }
 0x472   :  { %4412 = vmatprep.subr.mxu1 %v4747_v35 }
 0x485   :  { %v1684_v15 = vpop.xlane.xlu0 %1683 }
 0x489   :  { %v1681_v2 = vpop.xlane.xlu1 %1680 }
 0x48a   :  { %4661 = vrcp.f32 %v1681_v2 }
 0x48b   :  { %4663 = vrcp.f32 %v1684_v15 }
 0x48d   :  { %v1687_v39 = vpop.xlane.xlu1 %1686  ;;  %v1690_v51 = vpop.xlane.xlu0 %1689 }
 0x48e   :  { %4665 = vrcp.f32 %v1687_v39 }
 0x48f   :  { %4667 = vrcp.f32 %v1690_v51  ;;  %v1837_v51 = vld [vmem:[%s6302_s1 + $0x68] sm:$0xff] }
 0x491   :  { %v1693_v27 = vpop.xlane.xlu1 %1692  ;;  %v1696_v30 = vpop.xlane.xlu0 %1695 }
 0x494   :  { %v4662_v21 = vpop.eup %4661 }
 0x495   :  { %v1771_v49 = vmul.f32 %v4662_v21, %v5889_v36  ;;  %v1699_v25 = vpop.xlane.xlu1 %1698  ;;  %v4664_v40 = vpop.eup %4663  ;;  %v1831_v36 = vld [vmem:[%s6302_s1 + $0x38] sm:$0xff] }
 0x496   :  { %v1702_v41 = vpop.xlane.xlu0 %1701  ;;  %v1773_v43 = vmul.f32 %v4664_v40, %v5883_v34 }
 0x497   :  { %4669 = vrcp.f32 %v1702_v41  ;;  %4410 = vmatmul.mubr.msk.f32.vlgmr.msra.gmra.mrb[10].mxu1 %vm1471_vm1, %v1771_v49 }
 0x498   :  { %4671 = vrcp.f32 %v1693_v27  ;;  %4413 = vmatpush3.msra.mxu1 %v1830_v4  ;;  %4414 = vmatprep.mubr.msk.f32.mxu1 %vm4748_vm2, %v4747_v35  ;;  %v4666_v56 = vpop.eup %4665  ;;  %v1839_v4 = vld [vmem:[%s6302_s1 + $0x78] sm:$0xff] }
 0x499   :  { %v1705_v55 = vpop.xlane.xlu1 %1704  ;;  %4417 = vmatprep.subr.mxu1 %v4747_v35  ;;  %v1775_v11 = vmul.f32 %v4666_v56, %v5893_v33  ;;  %v4668_v52 = vpop.eup %4667 }
 0x49a   :  { %v1708_v32 = vpop.xlane.xlu0 %1707  ;;  %v1777_v33 = vmul.f32 %v4668_v52, %v5897_v1  ;;  %v1843_v52 = vld [vmem:[%s6302_s1 + $0x98] sm:$0xff] }
 0x49b   :  { %4673 = vrcp.f32 %v1708_v32  ;;  %4415 = vmatmul.mubr.msk.f32.vlgmr.msra.gmra.mrb[12].mxu1 %vm1471_vm1, %v1773_v43 }
 0x49c   :  { %4675 = vrcp.f32 %v1696_v30  ;;  %4418 = vmatpush3.msra.mxu1 %v1831_v36  ;;  %4419 = vmatprep.mubr.msk.f32.mxu1 %vm4748_vm2, %v4747_v35  ;;  %v1841_v36 = vld [vmem:[%s6302_s1 + $0x88] sm:$0xff] }
 0x49d   :  { %v1711_v34 = vpop.xlane.xlu1 %1710  ;;  %4422 = vmatprep.subr.mxu1 %v4747_v35 }
 0x49e   :  { %v1714_v23 = vpop.xlane.xlu0 %1713 }
 0x49f   :  { %4677 = vrcp.f32 %v1714_v23  ;;  %4420 = vmatmul.mubr.msk.f32.vlgmr.msra.gmra.mrb[14].mxu1 %vm1471_vm1, %v1775_v11 }
 0x4a0   :  { %4679 = vrcp.f32 %v1699_v25  ;;  %4423 = vmatpush3.msra.mxu1 %v1832_v13  ;;  %4424 = vmatprep.mubr.msk.f32.mxu1 %vm4748_vm2, %v4747_v35 }
 0x4a1   :  { %v4670_v60 = vpop.eup %4669  ;;  %v1717_v59 = vpop.xlane.xlu1 %1716  ;;  %4427 = vmatprep.subr.mxu1 %v4747_v35 }
 0x4a2   :  { %v4672_v48 = vpop.eup %4671  ;;  %v1785_v54 = vmul.f32 %v4670_v60, %v5917_v19  ;;  %v1720_v3 = vpop.xlane.xlu0 %1719  ;;  %v1834_v19 = vld [vmem:[%s6302_s1 + $0x50] sm:$0xff] }
 0x4a3   :  { %4681 = vrcp.f32 %v1720_v3  ;;  %4425 = vmatmul.mubr.msk.f32.vlgmr.msra.gmra.mrb[16].mxu1 %vm1471_vm1, %v1777_v33  ;;  %v1779_v45 = vmul.f32 %v4672_v48, %v5901_v44  ;;  %v1840_v44 = vld [vmem:[%s6302_s1 + $0x80] sm:$0xff] }
 0x4a4   :  { %4683 = vrcp.f32 %v1705_v55  ;;  %4445 = vmatmul.mubr.msk.f32.vlgmr.msra.gmra.mrb[8].mxu0 %vm1471_vm1, %v1785_v54  ;;  %4428 = vmatpush3.msra.mxu1 %v1833_v6  ;;  %v1845_v6 = vld [vmem:[%s6302_s1 + $0xa8] sm:$0xff] }
 0x4a5   :  { %v4674_v1 = vpop.eup %4673  ;;  %v1723_v61 = vpop.xlane.xlu1 %1722  ;;  %4429 = vmatprep.mubr.msk.f32.mxu1 %vm4748_vm2, %v4747_v35  ;;  %4453 = vmatpush3.msra.mxu0 %v1838_v17 }
 0x4a6   :  { %v4676_v10 = vpop.eup %4675  ;;  %v1789_v57 = vmul.f32 %v4674_v1, %v5927_v5  ;;  %v1726_v0 = vpop.xlane.xlu0 %1725  ;;  %4454 = vmatprep.mubr.msk.f32.mxu0 %vm4748_vm2, %v4747_v35  ;;  %4432 = vmatprep.subr.mxu1 %v4747_v35  ;;  %v1847_v1 = vld [vmem:[%s6302_s1 + $0xb8] sm:$0xff] }
 0x4a7   :  { %4685 = vrcp.f32 %v1726_v0  ;;  %4430 = vmatmul.mubr.msk.f32.vlgmr.msra.gmra.mrb[18].mxu1 %vm1471_vm1, %v1779_v45  ;;  %4462 = vmatprep.subr.mxu0 %v4747_v35  ;;  %v1781_v16 = vmul.f32 %v4676_v10, %v5907_v46  ;;  %v1842_v46 = vld [vmem:[%s6302_s1 + $0x90] sm:$0xff] }
 0x4a8   :  { %4687 = vrcp.f32 %v1711_v34  ;;  %4455 = vmatmul.mubr.msk.f32.vlgmr.msra.gmra.mrb[10].mxu0 %vm1471_vm1, %v1789_v57  ;;  %4433 = vmatpush3.msra.mxu1 %v1834_v19  ;;  %v1851_v57 = vld [vmem:[%s6302_s1 + $0xd8] sm:$0xff] }
 0x4a9   :  { %v4678_v5 = vpop.eup %4677  ;;  %4434 = vmatprep.mubr.msk.f32.mxu1 %vm4748_vm2, %v4747_v35  ;;  %4463 = vmatpush3.msra.mxu0 %v1840_v44  ;;  %v1729_v2 = vpop.xlane.xlu1 %1728 }
 0x4aa   :  { %v4680_v28 = vpop.eup %4679  ;;  %v1793_v50 = vmul.f32 %v4678_v5, %v5937_v14  ;;  %v1732_v15 = vpop.xlane.xlu0 %1731  ;;  %4464 = vmatprep.mubr.msk.f32.mxu0 %vm4748_vm2, %v4747_v35  ;;  %4437 = vmatprep.subr.mxu1 %v4747_v35 }
 0x4ab   :  { %4689 = vrcp.f32 %v1732_v15  ;;  %4435 = vmatmul.mubr.msk.f32.vlgmr.msra.gmra.mrb[20].mxu1 %vm1471_vm1, %v1781_v16  ;;  %4472 = vmatprep.subr.mxu0 %v4747_v35  ;;  %v1783_v39 = vmul.f32 %v4680_v28, %v5911_v63  ;;  %v1844_v63 = vld [vmem:[%s6302_s1 + $0xa0] sm:$0xff] }
 0x4ac   :  { %4691 = vrcp.f32 %v1717_v59  ;;  %4465 = vmatmul.mubr.msk.f32.vlgmr.msra.gmra.mrb[12].mxu0 %vm1471_vm1, %v1793_v50  ;;  %4438 = vmatpush3.msra.mxu1 %v1835_v29 }
 0x4ad   :  { %v4682_v14 = vpop.eup %4681  ;;  %4439 = vmatprep.mubr.msk.f32.mxu1 %vm4748_vm2, %v4747_v35  ;;  %4473 = vmatpush3.msra.mxu0 %v1842_v46  ;;  %v1735_v25 = vpop.xlane.xlu1 %1734 }
 0x4ae   :  { %v4684_v27 = vpop.eup %4683  ;;  %v1797_v30 = vmul.f32 %v4682_v14, %v5947_v47  ;;  %v1738_v21 = vpop.xlane.xlu0 %1737  ;;  %4474 = vmatprep.mubr.msk.f32.mxu0 %vm4748_vm2, %v4747_v35  ;;  %4447 = vmatprep.subr.mxu1 %v4747_v35 }
 0x4af   :  { %4693 = vrcp.f32 %v1738_v21  ;;  %4440 = vmatmul.mubr.msk.f32.vlgmr.msra.gmra.mrb[22].mxu1 %vm1471_vm1, %v1783_v39  ;;  %4482 = vmatprep.subr.mxu0 %v4747_v35  ;;  %v1787_v49 = vmul.f32 %v4684_v27, %v5921_v62  ;;  %v1846_v62 = vld [vmem:[%s6302_s1 + $0xb0] sm:$0xff] }
 0x4b0   :  { %4695 = vrcp.f32 %v1723_v61  ;;  %4475 = vmatmul.mubr.msk.f32.vlgmr.msra.gmra.mrb[14].mxu0 %vm1471_vm1, %v1797_v30  ;;  %4448 = vmatpush3.msra.mxu1 %v1837_v51 }
 0x4b1   :  { %v4686_v47 = vpop.eup %4685  ;;  %4449 = vmatprep.mubr.msk.f32.mxu1 %vm4748_vm2, %v4747_v35  ;;  %4483 = vmatpush3.msra.mxu0 %v1844_v63  ;;  %v1741_v11 = vpop.xlane.xlu1 %1740 }
 0x4b2   :  { %v4688_v40 = vpop.eup %4687  ;;  %v1801_v41 = vmul.f32 %v4686_v47, %v5957_v58  ;;  %v1744_v43 = vpop.xlane.xlu0 %1743  ;;  %4484 = vmatprep.mubr.msk.f32.mxu0 %vm4748_vm2, %v4747_v35  ;;  %4457 = vmatprep.subr.mxu1 %v4747_v35 }
 0x4b3   :  { %4697 = vrcp.f32 %v1744_v43  ;;  %4450 = vmatmul.mubr.msk.f32.vlgmr.msra.gmra.mrb[24].mxu1 %vm1471_vm1, %v1787_v49  ;;  %4492 = vmatprep.subr.mxu0 %v4747_v35  ;;  %v1791_v55 = vmul.f32 %v4688_v40, %v5931_v38  ;;  %v1848_v38 = vld [vmem:[%s6302_s1 + $0xc0] sm:$0xff] }
 0x4b4   :  { %4699 = vrcp.f32 %v1729_v2  ;;  %4485 = vmatmul.mubr.msk.f32.vlgmr.msra.gmra.mrb[16].mxu0 %vm1471_vm1, %v1801_v41  ;;  %4458 = vmatpush3.msra.mxu1 %v1839_v4 }
 0x4b5   :  { %v4690_v58 = vpop.eup %4689  ;;  %4459 = vmatprep.mubr.msk.f32.mxu1 %vm4748_vm2, %v4747_v35  ;;  %4493 = vmatpush3.msra.mxu0 %v1846_v62  ;;  %4701 = vrcp.f32 %v1735_v25  ;;  %v1747_v59 = vpop.xlane.xlu1 %1746 }
 0x4b6   :  { %v4692_v56 = vpop.eup %4691  ;;  %v1805_v32 = vmul.f32 %v4690_v58, %v5966_v31  ;;  %4494 = vmatprep.mubr.msk.f32.mxu0 %vm4748_vm2, %v4747_v35  ;;  %4467 = vmatprep.subr.mxu1 %v4747_v35 }
 0x4b7   :  { %4460 = vmatmul.mubr.msk.f32.vlgmr.msra.gmra.mrb[26].mxu1 %vm1471_vm1, %v1791_v55  ;;  %v1750_v34 = vpop.xlane.xlu0 %1749  ;;  %4502 = vmatprep.subr.mxu0 %v4747_v35  ;;  %v1795_v13 = vmul.f32 %v4692_v56, %v5941_v22  ;;  %v1850_v22 = vld [vmem:[%s6302_s1 + $0xd0] sm:$0xff] }
 0x4b8   :  { %4495 = vmatmul.mubr.msk.f32.vlgmr.msra.gmra.mrb[18].mxu0 %vm1471_vm1, %v1805_v32  ;;  %4703 = vrcp.f32 %v1750_v34  ;;  %4468 = vmatpush3.msra.mxu1 %v1841_v36 }
 0x4b9   :  { %v4694_v31 = vpop.eup %4693  ;;  %4469 = vmatprep.mubr.msk.f32.mxu1 %vm4748_vm2, %v4747_v35  ;;  %4503 = vmatpush3.msra.mxu0 %v1848_v38  ;;  %4705 = vrcp.f32 %v1741_v11 }
 0x4ba   :  { %v4696_v23 = vpop.eup %4695  ;;  %v1809_v60 = vmul.f32 %v4694_v31, %v5975_v7  ;;  %4504 = vmatprep.mubr.msk.f32.mxu0 %vm4748_vm2, %v4747_v35  ;;  %4477 = vmatprep.subr.mxu1 %v4747_v35  ;;  %4707 = vrcp.f32 %v1747_v59 }
 0x4bb   :  { %4470 = vmatmul.mubr.msk.f32.vlgmr.msra.gmra.mrb[28].mxu1 %vm1471_vm1, %v1795_v13  ;;  %4512 = vmatprep.subr.mxu0 %v4747_v35  ;;  %v1799_v7 = vmul.f32 %v4696_v23, %v5951_v26  ;;  %v1852_v26 = vld [vmem:[%s6302_s1 + $0xe0] sm:$0xff]  ;;  %v1753_v17 = vpop.xlane.xlu1 %1752 }
 0x4bc   :  { %4505 = vmatmul.mubr.msk.f32.vlgmr.msra.gmra.mrb[20].mxu0 %vm1471_vm1, %v1809_v60  ;;  %4478 = vmatpush3.msra.mxu1 %v1843_v52  ;;  %4709 = vrcp.f32 %v1753_v17 }
 0x4bd   :  { %v4698_v33 = vpop.eup %4697  ;;  %4479 = vmatprep.mubr.msk.f32.mxu1 %vm4748_vm2, %v4747_v35  ;;  %4513 = vmatpush3.msra.mxu0 %v1850_v22 }
 0x4be   :  { %v4700_v48 = vpop.eup %4699  ;;  %v1813_v54 = vmul.f32 %v4698_v33, %v5983_v37  ;;  %4514 = vmatprep.mubr.msk.f32.mxu0 %vm4748_vm2, %v4747_v35  ;;  %4487 = vmatprep.subr.mxu1 %v4747_v35 }
 0x4bf   :  { %4480 = vmatmul.mubr.msk.f32.vlgmr.msra.gmra.mrb[30].mxu1 %vm1471_vm1, %v1799_v7  ;;  %4522 = vmatprep.subr.mxu0 %v4747_v35  ;;  %v4702_v3 = vpop.eup %4701  ;;  %v1803_v37 = vmul.f32 %v4700_v48, %v5961_v20  ;;  %v1854_v20 = vld [vmem:[%s6302_s1 + $0xf0] sm:$0xff] }
 0x4c0   :  { %4515 = vmatmul.mubr.msk.f32.vlgmr.msra.gmra.mrb[22].mxu0 %vm1471_vm1, %v1813_v54  ;;  %4488 = vmatpush3.msra.mxu1 %v1845_v6  ;;  %v1807_v19 = vmul.f32 %v4702_v3, %v5970_v24 }
 0x4c1   :  { %4489 = vmatprep.mubr.msk.f32.mxu1 %vm4748_vm2, %v4747_v35  ;;  %4523 = vmatpush3.msra.mxu0 %v1852_v26 }
 0x4c2   :  { %v4704_v45 = vpop.eup %4703  ;;  %4524 = vmatprep.mubr.msk.f32.mxu0 %vm4748_vm2, %v4747_v35  ;;  %4497 = vmatprep.subr.mxu1 %v4747_v35 }
 0x4c3   :  { %v1817_v61 = vmul.f32 %v4704_v45, %v5997_v12  ;;  %4490 = vmatmul.mubr.msk.f32.vlgmr.msra.gmra.mrb[32].mxu1 %vm1471_vm1, %v1803_v37  ;;  %4532 = vmatprep.subr.mxu0 %v4747_v35  ;;  %v1849_v12 = vld [vmem:[%s6302_s1 + $0xc8] sm:$0xff]  ;;  %v4706_v10 = vpop.eup %4705 }
 0x4c4   :  { %4498 = vmatpush3.msra.mxu1 %v1847_v1  ;;  %4499 = vmatprep.mubr.msk.f32.mxu1 %vm4748_vm2, %v4747_v35  ;;  %v1811_v24 = vmul.f32 %v4706_v10, %v5979_v9  ;;  %v4708_v0 = vpop.eup %4707  ;;  %v1853_v9 = vld [vmem:[%s6302_s1 + $0xe8] sm:$0xff] }
 0x4c5   :  { %4525 = vmatmul.mubr.msk.f32.vlgmr.msra.gmra.mrb[24].mxu0 %vm1471_vm1, %v1817_v61  ;;  %4507 = vmatprep.subr.mxu1 %v4747_v35  ;;  %v1815_v44 = vmul.f32 %v4708_v0, %v5990_v8  ;;  %v1855_v8 = vld [vmem:[%s6302_s1 + $0xf8] sm:$0xff]  ;;  %s4749_s1 = smov [#allocation3]  }
 0x4c6   :  { %4533 = vmatpush3.msra.mxu0 %v1854_v20  ;;  %4534 = vmatprep.mubr.msk.f32.mxu0 %vm4748_vm2, %v4747_v35  ;;  %v4710_v5 = vpop.eup %4709  ;;  %s4230_s29 = sshll.u32 %s4749_s1, 4  ;;  %s4231_s29 = int_to_ptr.vmem [resolvable:$true] %s4230_s29 }
 0x4c7   :  { %4500 = vmatmul.mubr.msk.f32.vlgmr.msra.gmra.mrb[34].mxu1 %vm1471_vm1, %v1807_v19  ;;  %v1819_v16 = vmul.f32 %v4710_v5, %v6001_v42  ;;  %s4715_s30 = scalar_lea.vmem %s4231_s29, 4096  ;;  %p4720_p1 = scmp.lt.s32.totalorder %s4231_s29, %s4231_s29 }
 0x4c8   :  { %4508 = vmatpush3.msra.mxu1 %v1849_v12  ;;  %4509 = vmatprep.mubr.msk.f32.mxu1 %vm4748_vm2, %v4747_v35  ;;  %p4716_p0 = scmp.ne.s32.totalorder %s4231_s29, %s4715_s30  ;;  %p4721_p2 = scmp.lt.s32.totalorder %s4715_s30, %s4715_s30 }
 0x4c9   :  { %4517 = vmatprep.subr.mxu1 %v4747_v35 }
 0x4ca   :  { %p4722_p3 = por %p4721_p2, %p4720_p1 }
 0x4cb   :  { %4510 = vmatmul.mubr.msk.f32.vlgmr.msra.gmra.mrb[36].mxu1 %vm1471_vm1, %v1811_v24 }
 0x4cc   :  { %4518 = vmatpush3.msra.mxu1 %v1851_v57  ;;  %4519 = vmatprep.mubr.msk.f32.mxu1 %vm4748_vm2, %v4747_v35  ;;  %p4723_p4 = pnand %p4722_p3, %p4716_p0 }
 0x4cd   :  { %4527 = vmatprep.subr.mxu1 %v4747_v35 }
 0x4cf   :  { %4520 = vmatmul.mubr.msk.f32.vlgmr.msra.gmra.mrb[38].mxu1 %vm1471_vm1, %v1815_v44 }
 0x4d0   :  { %4528 = vmatpush3.msra.mxu1 %v1853_v9  ;;  %4529 = vmatprep.mubr.msk.f32.mxu1 %vm4748_vm2, %v4747_v35 }
 0x4d1   :  { %4537 = vmatprep.subr.mxu1 %v4747_v35 }
 0x4d3   :  { %4530 = vmatmul.mubr.msk.f32.vlgmr.msra.gmra.mrb[40].mxu1 %vm1471_vm1, %v1819_v16 }
 0x4d4   :  { %4538 = vmatpush3.msra.mxu1 %v1855_v8  ;;  %4539 = vmatprep.mubr.msk.f32.mxu1 %vm4748_vm2, %v4747_v35 }
 0x4eb   :  { %v1756_v29 = vpop.xlane.xlu0 %1755 }
 0x4ec   :  { %4711 = vrcp.f32 %v1756_v29 }
 0x4ef   :  { %v1759_v28 = vpop.xlane.xlu1 %1758 }
 0x4f0   :  { %4713 = vrcp.f32 %v1759_v28 }
 0x4f6   :  { %v4712_v50 = vpop.eup %4711 }
 0x4f7   :  { %v1821_v15 = vmul.f32 %v4712_v50, %v6007_v53 }
 0x4f9   :  { %4535 = vmatmul.mubr.msk.f32.vlgmr.msra.gmra.mrb[26].mxu0 %vm1471_vm1, %v1821_v15 }
 0x4fa   :  { %v4714_v42 = vpop.eup %4713 }
 0x4fb   :  { %v1823_v46 = vmul.f32 %v4714_v42, %v6015_v18 }
 0x4fd   :  { %4540 = vmatmul.mubr.msk.f32.vlgmr.msra.gmra.mrb[42].mxu1 %vm1471_vm1, %v1823_v46 }
 0x533   :  { %v1925_v2 = vpop.f32.mrb[0].mxu1 }
 0x534   :  { %4193 = vst.msk [vmem:[#allocation3] sm:$0xff] %vm4192_vm3, %v1925_v2  ;;  %v4386_v14 = vpop.f32.mrb[1].mxu1 }
 0x537   :  { %v1998_v35 = vpop.f32.mrb[2].mxu1 }
 0x538   :  { %4194 = vst.msk [vmem:[#allocation3 + $0x8] sm:$0xff] %vm4192_vm3, %v1998_v35  ;;  %v4391_v39 = vpop.f32.mrb[3].mxu1 }
 0x53b   :  { %v2071_v51 = vpop.f32.mrb[4].mxu1 }
 0x53c   :  { %4195 = vst.msk [vmem:[#allocation3 + $0x10] sm:$0xff] %vm4192_vm3, %v2071_v51  ;;  %v4396_v53 = vpop.f32.mrb[5].mxu1 }
 0x53f   :  { %v2144_v27 = vpop.f32.mrb[6].mxu1 }
 0x540   :  { %4196 = vst.msk [vmem:[#allocation3 + $0x18] sm:$0xff] %vm4192_vm3, %v2144_v27  ;;  %v4401_v30 = vpop.f32.mrb[7].mxu1 }
 0x543   :  { %v2217_v18 = vpop.f32.mrb[8].mxu1 }
 0x544   :  { %4197 = vst.msk [vmem:[#allocation3 + $0x20] sm:$0xff] %vm4192_vm3, %v2217_v18  ;;  %v4406_v21 = vpop.f32.mrb[9].mxu1 }
 0x56a   :  { %v2290_v63 = vpop.f32.mrb[10].mxu1 }
 0x56b   :  { %4198 = vst.msk [vmem:[#allocation3 + $0x28] sm:$0xff] %vm4192_vm3, %v2290_v63  ;;  %v4411_v47 = vpop.f32.mrb[11].mxu1 }
 0x56e   :  { %v2363_v49 = vpop.f32.mrb[12].mxu1 }
 0x56f   :  { %4199 = vst.msk [vmem:[#allocation3 + $0x30] sm:$0xff] %vm4192_vm3, %v2363_v49  ;;  %v4416_v25 = vpop.f32.mrb[13].mxu1 }
 0x572   :  { %v2436_v4 = vpop.f32.mrb[14].mxu1 }
 0x573   :  { %4200 = vst.msk [vmem:[#allocation3 + $0x38] sm:$0xff] %vm4192_vm3, %v2436_v4  ;;  %v4421_v40 = vpop.f32.mrb[15].mxu1 }
 0x576   :  { %v2509_v41 = vpop.f32.mrb[16].mxu1 }
 0x577   :  { %4201 = vst.msk [vmem:[#allocation3 + $0x40] sm:$0xff] %vm4192_vm3, %v2509_v41  ;;  %v2801_v43 = vpop.f32.mrb[8].mxu0  ;;  %v4426_v62 = vpop.f32.mrb[17].mxu1 }
 0x578   :  { %4205 = vst.msk [vmem:[#allocation3 + $0x60] sm:$0xff] %vm4192_vm3, %v2801_v43  ;;  %v4446_v58 = vpop.f32.mrb[9].mxu0 }
 0x57a   :  { %v2582_v55 = vpop.f32.mrb[18].mxu1 }
 0x57b   :  { %4202 = vst.msk [vmem:[#allocation3 + $0x48] sm:$0xff] %vm4192_vm3, %v2582_v55  ;;  %v2947_v36 = vpop.f32.mrb[10].mxu0  ;;  %v4431_v56 = vpop.f32.mrb[19].mxu1 }
 0x57c   :  { %4207 = vst.msk [vmem:[#allocation3 + $0x70] sm:$0xff] %vm4192_vm3, %v2947_v36  ;;  %v4456_v32 = vpop.f32.mrb[11].mxu0 }
 0x57e   :  { %v2655_v38 = vpop.f32.mrb[20].mxu1 }
 0x57f   :  { %4203 = vst.msk [vmem:[#allocation3 + $0x50] sm:$0xff] %vm4192_vm3, %v2655_v38  ;;  %v3093_v11 = vpop.f32.mrb[12].mxu0  ;;  %v4436_v34 = vpop.f32.mrb[21].mxu1 }
 0x580   :  { %4209 = vst.msk [vmem:[#allocation3 + $0x80] sm:$0xff] %vm4192_vm3, %v3093_v11  ;;  %v4466_v31 = vpop.f32.mrb[13].mxu0 }
 0x582   :  { %v2728_v13 = vpop.f32.mrb[22].mxu1 }
 0x583   :  { %4204 = vst.msk [vmem:[#allocation3 + $0x58] sm:$0xff] %vm4192_vm3, %v2728_v13  ;;  %v3239_v52 = vpop.f32.mrb[14].mxu0  ;;  %v4441_v23 = vpop.f32.mrb[23].mxu1 }
 0x584   :  { %4211 = vst.msk [vmem:[#allocation3 + $0x90] sm:$0xff] %vm4192_vm3, %v3239_v52  ;;  %v4476_v60 = vpop.f32.mrb[15].mxu0 }
 0x586   :  { %v2874_v22 = vpop.f32.mrb[24].mxu1 }
 0x587   :  { %4206 = vst.msk [vmem:[#allocation3 + $0x68] sm:$0xff] %vm4192_vm3, %v2874_v22  ;;  %v3385_v33 = vpop.f32.mrb[16].mxu0  ;;  %v4451_v7 = vpop.f32.mrb[25].mxu1 }
 0x588   :  { %4213 = vst.msk [vmem:[#allocation3 + $0xa0] sm:$0xff] %vm4192_vm3, %v3385_v33  ;;  %v4486_v59 = vpop.f32.mrb[17].mxu0 }
 0x58a   :  { %v3020_v6 = vpop.f32.mrb[26].mxu1 }
 0x58b   :  { %4208 = vst.msk [vmem:[#allocation3 + $0x78] sm:$0xff] %vm4192_vm3, %v3020_v6  ;;  %v3531_v48 = vpop.f32.mrb[18].mxu0  ;;  %v4461_v54 = vpop.f32.mrb[27].mxu1 }
 0x58c   :  { %4215 = vst.msk [vmem:[#allocation3 + $0xb0] sm:$0xff] %vm4192_vm3, %v3531_v48  ;;  %v4496_v26 = vpop.f32.mrb[19].mxu0 }
 0x58e   :  { %v3166_v3 = vpop.f32.mrb[28].mxu1 }
 0x58f   :  { %4210 = vst.msk [vmem:[#allocation3 + $0x88] sm:$0xff] %vm4192_vm3, %v3166_v3  ;;  %v3677_v37 = vpop.f32.mrb[20].mxu0  ;;  %v4471_v17 = vpop.f32.mrb[29].mxu1 }
 0x590   :  { %4217 = vst.msk [vmem:[#allocation3 + $0xc0] sm:$0xff] %vm4192_vm3, %v3677_v37  ;;  %v4506_v1 = vpop.f32.mrb[21].mxu0 }
 0x592   :  { %v3312_v45 = vpop.f32.mrb[30].mxu1 }
 0x593   :  { %4212 = vst.msk [vmem:[#allocation3 + $0x98] sm:$0xff] %vm4192_vm3, %v3312_v45  ;;  %v3823_v61 = vpop.f32.mrb[22].mxu0  ;;  %v4481_v20 = vpop.f32.mrb[31].mxu1 }
 0x594   :  { %4219 = vst.msk [vmem:[#allocation3 + $0xd0] sm:$0xff] %vm4192_vm3, %v3823_v61  ;;  %v4516_v19 = vpop.f32.mrb[23].mxu0 }
 0x596   :  { %v3458_v12 = vpop.f32.mrb[32].mxu1 }
 0x597   :  { %4214 = vst.msk [vmem:[#allocation3 + $0xa8] sm:$0xff] %vm4192_vm3, %v3458_v12  ;;  %v4491_v10 = vpop.f32.mrb[33].mxu1 }
 0x598   :  { %v3969_v24 = vpop.f32.mrb[24].mxu0 }
 0x599   :  { %4221 = vst.msk [vmem:[#allocation3 + $0xe0] sm:$0xff] %vm4192_vm3, %v3969_v24  ;;  %v4526_v57 = vpop.f32.mrb[25].mxu0 }
 0x59a   :  { %v3604_v0 = vpop.f32.mrb[34].mxu1 }
 0x59b   :  { %4216 = vst.msk [vmem:[#allocation3 + $0xb8] sm:$0xff] %vm4192_vm3, %v3604_v0  ;;  %v4501_v44 = vpop.f32.mrb[35].mxu1 }
 0x59e   :  { %v3750_v9 = vpop.f32.mrb[36].mxu1 }
 0x59f   :  { %4218 = vst.msk [vmem:[#allocation3 + $0xc8] sm:$0xff] %vm4192_vm3, %v3750_v9  ;;  %v4511_v5 = vpop.f32.mrb[37].mxu1 }
 0x5a2   :  { %v3896_v16 = vpop.f32.mrb[38].mxu1 }
 0x5a3   :  { %4220 = vst.msk [vmem:[#allocation3 + $0xd8] sm:$0xff] %vm4192_vm3, %v3896_v16  ;;  %v4521_v8 = vpop.f32.mrb[39].mxu1 }
 0x5a6   :  { %v4042_v29 = vpop.f32.mrb[40].mxu1 }
 0x5a7   :  { %4222 = vst.msk [vmem:[#allocation3 + $0xe8] sm:$0xff] %vm4192_vm3, %v4042_v29  ;;  %v4531_v28 = vpop.f32.mrb[41].mxu1 }
 0x5cc   :  { %v4115_v50 = vpop.f32.mrb[26].mxu0 }
 0x5cd   :  { %4223 = vst.msk [vmem:[#allocation3 + $0xf0] sm:$0xff] %vm4192_vm3, %v4115_v50  ;;  %v4536_v15 = vpop.f32.mrb[27].mxu0 }
 0x5d0   :  { %v4188_v42 = vpop.f32.mrb[42].mxu1 }
 0x5d1   :  { %4224 = vst.msk [vmem:[#allocation3 + $0xf8] sm:$0xff] %vm4192_vm3, %v4188_v42  ;;  %v4541_v46 = vpop.f32.mrb[43].mxu1 }
 0x5d2   :  { %4726 = shalt.err (!%p4723_p4)
}
 0x5d3   :  { %s4727_s7 = scalar_lea.hbm %s6305_s4, 4096 }
 0x5d4   :  { %p4728_p5 = scmp.ne.s32.totalorder %s6305_s4, %s4727_s7  ;;  %p4731_p6 = scmp.lt.u32.totalorder %s4727_s7, %s6305_s4 }
 0x5d6   :  { %p4733_p7 = pnand %p4731_p6, %p4728_p5 }
 0x5d8   :  { %4736 = shalt.err (!%p4733_p7)
}
 0x5d9   :  { %s4750_s11 = smov 128   ;;  %s4751_s12 = smov 8  }
 0x5da   :  { %4236 = dma.vmem_to_hbm [thread:$0]  %s4231_s29, 4096, %s6305_s4, [#allocation4], %s4750_s11, %s4750_s11, %s4751_s12  }
 0x5db   :  { %4737 = dma.done.wait [#allocation4], 4096  }
 0x5dc   :  { %4738 = vsyncadd [#allocation4], 4294963200 }
 0x5dd   :  { %4240 = vsyncpa [#allocation4], 1 }

</bundles_post_ra>
